<compile_context>
chip_gen: v6e
topology: v6e:2x2x1
jax: 0.10.0
libtpu: 0.0.40
codegen_flags: <defaults>
</compile_context>

<pallas_src>
import functools

import jax
import jax.numpy as jnp
from jax.experimental import pallas as pl
from jax.experimental.pallas import tpu as pltpu


def _round_up(x, m):
    return (x + m - 1) // m * m


def _choose_tiling(num_nodes):
    """Row tile TM and padded node count.  Keeps >= 2 row tiles (v7x has two
    TensorCores) and streams A as full (TM, n_pad) row panels (K collapsed)."""
    if num_nodes <= 512:
        n_pad = _round_up(num_nodes, 256)
        tm = n_pad // 2
    else:
        tm = 512
        n_pad = _round_up(num_nodes, tm)
    # TODO(synk): for graphs where a (tm, n_pad) int8 row panel no longer fits
    # the 32 MiB VMEM budget (n >~ 14k nodes), reintroduce a K-tiled
    # accumulation axis (rectangular TM x 2048 A blocks + f32 scratch).
    return n_pad, tm


def _a_spec(block_shape, index_map, n_steps):
    """BlockSpec for the adjacency stream; 3-deep pipeline when useful."""
    depth = min(3, n_steps)
    if depth <= 2:
        return pl.BlockSpec(block_shape, index_map)
    try:
        return pl.BlockSpec(block_shape, index_map,
                            pipeline_mode=pl.Buffered(depth))
    except (AttributeError, TypeError):
        return pl.BlockSpec(block_shape, index_map)


# ---------------------------------------------------------------------------
# Kernel 1: per-node feature transform   Y1[j] = d[j] * (X[j] @ W1^T)
# ---------------------------------------------------------------------------
def feature_transform_kernel(x_ref, w1t_ref, d_ref, y_ref):
    xw = jnp.dot(x_ref[...], w1t_ref[...], preferred_element_type=jnp.float32)
    y_ref[...] = (d_ref[...] * xw).astype(y_ref.dtype)


# ---------------------------------------------------------------------------
# Kernel 2: layer-1 SpMM over a full (TM, n_pad) row panel of A (K collapsed)
#   H  = leaky_relu(d[i] * (A[i,:] @ Y1) + b1)
#   Y2 = d[i] * (H @ W2^T)            (layer-2 feature transform fused here)
# ---------------------------------------------------------------------------
def gcn_layer1_kernel(a_ref, y_ref, d_ref, b1_ref, w2t_ref, y2_ref):
    a = a_ref[...].astype(jnp.bfloat16)          # int8 -> bf16 (hidden under DMA)
    acc = jnp.dot(a, y_ref[...], preferred_element_type=jnp.float32)
    d = d_ref[...]
    h = d * acc + b1_ref[...]
    h = jnp.where(h > 0, h, 0.01 * h)            # F.leaky_relu (slope 0.01)
    # TODO(synk): F.dropout treated as eval-mode identity (no RNG masking).
    xw2 = jnp.dot(h.astype(w2t_ref.dtype), w2t_ref[...],
                  preferred_element_type=jnp.float32)
    y2_ref[...] = (d * xw2).astype(y2_ref.dtype)


# ---------------------------------------------------------------------------
# Kernel 3: layer-2 SpMM row panel + bias + masked log_softmax over classes
# ---------------------------------------------------------------------------
def gcn_layer2_kernel(a_ref, y_ref, d_ref, b2_ref, o_ref, *, num_classes):
    a = a_ref[...].astype(jnp.bfloat16)
    acc = jnp.dot(a, y_ref[...], preferred_element_type=jnp.float32)
    z = d_ref[...] * acc + b2_ref[...]
    # mask lane-padded class columns so they don't pollute the softmax
    col = jax.lax.broadcasted_iota(jnp.int32, z.shape, 1)
    z = jnp.where(col < num_classes, z, -1e30)
    m = jnp.max(z, axis=1, keepdims=True)
    zz = z - m
    lse = jnp.log(jnp.sum(jnp.exp(zz), axis=1, keepdims=True))
    o_ref[...] = zz - lse


# ---------------------------------------------------------------------------
# Once-per-graph preprocessing (hoisted out of the jitted forward).
# ---------------------------------------------------------------------------
def preprocess_graph(edge_index, num_nodes):
    """Dense A_hat (self loops added) stored as int8, and d = D^-1/2 of the
    column degree (matching degree(edge_index_with_self_loops[1]))."""
    n_pad, _ = _choose_tiling(num_nodes)
    loops = jnp.arange(num_nodes, dtype=edge_index.dtype)
    row = jnp.concatenate([edge_index[0], loops])
    col = jnp.concatenate([edge_index[1], loops])
    counts = jnp.zeros((n_pad, n_pad), jnp.int32).at[row, col].add(1)
    a_hat = counts.astype(jnp.int8)              # tiny multiplicities -> exact
    deg = jnp.zeros((num_nodes,), jnp.float32).at[edge_index[1]].add(1.0) + 1.0
    d = jnp.where(deg > 0, jax.lax.rsqrt(deg), 0.0)
    d_pad = jnp.zeros((n_pad, 1), jnp.float32).at[:num_nodes, 0].set(d)
    return a_hat, d_pad


def mynet_forward(x, a_hat, d_pad, w1, b1, w2, b2):
    """x: (N,F) f32, a_hat: (n_pad,n_pad) int8, d_pad: (n_pad,1) f32.
    Returns (N, num_classes) log-probabilities (f32)."""
    n, f = x.shape
    hidden = w1.shape[0]
    num_classes = w2.shape[0]
    n_pad, tm = _choose_tiling(n)
    assert a_hat.shape == (n_pad, n_pad) and d_pad.shape == (n_pad, 1)
    n_i = n_pad // tm

    f_pad = _round_up(f, 128)
    h_pad = _round_up(hidden, 128)
    c_pad = _round_up(num_classes, 128)

    f32, bf16 = jnp.float32, jnp.bfloat16

    x_pad = jnp.zeros((n_pad, f_pad), f32).at[:n, :f].set(x).astype(bf16)
    w1t = jnp.zeros((f_pad, h_pad), f32).at[:f, :hidden].set(w1.T).astype(bf16)
    b1p = jnp.zeros((1, h_pad), f32).at[0, :hidden].set(b1)
    w2t = (jnp.zeros((h_pad, c_pad), f32)
           .at[:hidden, :num_classes].set(w2.T).astype(bf16))
    b2p = jnp.zeros((1, c_pad), f32).at[0, :num_classes].set(b2)

    params = pltpu.CompilerParams(
        dimension_semantics=("parallel",),
        vmem_limit_bytes=32 * 1024 * 1024,       # safe on v7x's 64 MiB VMEM too
    )

    # ---- pass 1: Y1 = d * (X @ W1^T) ---------------------------------------
    y1 = pl.pallas_call(
        feature_transform_kernel,
        out_shape=jax.ShapeDtypeStruct((n_pad, h_pad), bf16),
        grid=(n_i,),
        in_specs=[
            pl.BlockSpec((tm, f_pad), lambda i: (i, 0)),
            pl.BlockSpec((f_pad, h_pad), lambda i: (0, 0)),
            pl.BlockSpec((tm, 1), lambda i: (i, 0)),
        ],
        out_specs=pl.BlockSpec((tm, h_pad), lambda i: (i, 0)),
        compiler_params=params,
        cost_estimate=pl.CostEstimate(
            flops=2 * n_pad * f_pad * h_pad, transcendentals=0,
            bytes_accessed=2 * (n_pad * f_pad + f_pad * h_pad + n_pad * h_pad)),
    )(x_pad, w1t, d_pad)

    # ---- pass 2: Y2 = d * (leaky_relu(d * (A @ Y1) + b1) @ W2^T) -----------
    # A streamed as int8 row panels (K collapsed); Y1 resident in VMEM.
    y2 = pl.pallas_call(
        gcn_layer1_kernel,
        out_shape=jax.ShapeDtypeStruct((n_pad, c_pad), bf16),
        grid=(n_i,),
        in_specs=[
            _a_spec((tm, n_pad), lambda i: (i, 0), n_i),
            pl.BlockSpec((n_pad, h_pad), lambda i: (0, 0)),   # resident Y1
            pl.BlockSpec((tm, 1), lambda i: (i, 0)),
            pl.BlockSpec((1, h_pad), lambda i: (0, 0)),
            pl.BlockSpec((h_pad, c_pad), lambda i: (0, 0)),
        ],
        out_specs=pl.BlockSpec((tm, c_pad), lambda i: (i, 0)),
        compiler_params=params,
        cost_estimate=pl.CostEstimate(
            flops=2 * n_pad * n_pad * h_pad + 2 * n_pad * h_pad * c_pad,
            transcendentals=0,
            bytes_accessed=n_pad * n_pad + 2 * n_pad * h_pad + 2 * n_pad * c_pad),
    )(a_hat, y1, d_pad, b1p, w2t)

    # ---- pass 3: out = log_softmax(d * (A @ Y2) + b2) ----------------------
    out = pl.pallas_call(
        functools.partial(gcn_layer2_kernel, num_classes=num_classes),
        out_shape=jax.ShapeDtypeStruct((n_pad, c_pad), f32),
        grid=(n_i,),
        in_specs=[
            _a_spec((tm, n_pad), lambda i: (i, 0), n_i),
            pl.BlockSpec((n_pad, c_pad), lambda i: (0, 0)),   # resident Y2
            pl.BlockSpec((tm, 1), lambda i: (i, 0)),
            pl.BlockSpec((1, c_pad), lambda i: (0, 0)),
        ],
        out_specs=pl.BlockSpec((tm, c_pad), lambda i: (i, 0)),
        compiler_params=params,
        cost_estimate=pl.CostEstimate(
            flops=2 * n_pad * n_pad * c_pad,
            transcendentals=2 * n_pad * c_pad,
            bytes_accessed=n_pad * n_pad + 2 * n_pad * c_pad + 4 * n_pad * c_pad),
    )(a_hat, y2, d_pad, b2p)

    return out[:n, :num_classes]


def init_linear(key, out_features, in_features):
    """Deterministic nn.Linear-style init: U(-1/sqrt(fan_in), 1/sqrt(fan_in))."""
    kw, kb = jax.random.split(key)
    bound = 1.0 / jnp.sqrt(jnp.float32(in_features))
    w = jax.random.uniform(kw, (out_features, in_features), jnp.float32,
                           minval=-bound, maxval=bound)
    b = jax.random.uniform(kb, (out_features,), jnp.float32,
                           minval=-bound, maxval=bound)
    return w, b


def reference_forward(x, edge_index, w1, b1, w2, b2):
    """Pure-JAX mirror of the PyTorch MyNet forward (eval mode)."""
    n = x.shape[0]
    loops = jnp.arange(n, dtype=edge_index.dtype)
    row = jnp.concatenate([edge_index[0], loops])
    col = jnp.concatenate([edge_index[1], loops])
    a_hat = jnp.zeros((n, n), jnp.float32).at[row, col].add(1.0)
    deg = jnp.zeros((n,), jnp.float32).at[col].add(1.0)
    dinv = jnp.where(deg > 0, deg ** -0.5, 0.0)
    a_norm = dinv[:, None] * a_hat * dinv[None, :]
    h = a_norm @ x @ w1.T + b1
    h = jnp.where(h > 0, h, 0.01 * h)
    z = a_norm @ h @ w2.T + b2
    return jax.nn.log_softmax(z, axis=1)


if __name__ == "__main__":
    # Small synthetic shapes standing in for Cora:
    #   N nodes = 32, in_features = 32, hidden = 16, num_classes = 8, E = 64
    N, F_IN, HIDDEN, NUM_CLASSES, E = 32, 32, 16, 8, 64

    key = jax.random.PRNGKey(0)
    kx, ke, k1, k2 = jax.random.split(key, 4)

    x = jax.random.normal(kx, (N, F_IN), jnp.float32)
    edge_index = jax.random.randint(ke, (2, E), 0, N, dtype=jnp.int32)

    w1, b1 = init_linear(k1, HIDDEN, F_IN)         # conv1.lin
    w2, b2 = init_linear(k2, NUM_CLASSES, HIDDEN)  # conv2.lin

    # Once-per-graph preprocessing, hoisted out of the timed forward.
    a_hat, d_pad = preprocess_graph(edge_index, N)

    fwd = jax.jit(mynet_forward)
    out = jax.block_until_ready(fwd(x, a_hat, d_pad, w1, b1, w2, b2))

    assert out.shape == (N, NUM_CLASSES)
    assert bool(jnp.all(jnp.isfinite(out)))
    # rows are log-probabilities
    assert bool(jnp.allclose(jnp.sum(jnp.exp(out), axis=1), 1.0, atol=1e-3))
    # numerical match against the f32 pure-JAX reference (loose: bf16 storage)
    with jax.default_matmul_precision("float32"):
        ref = reference_forward(x, edge_index, w1, b1, w2, b2)
    assert bool(jnp.max(jnp.abs(out - ref)) < 1e-1)

    print("KERNEL_OK")
</pallas_src>

<mosaic_0001>
module attributes {stable_mosaic.version = 11 : i64} {
  func.func @feature_transform_kernel(%arg0: i32, %arg1: memref<128x128xbf16, #tpu.memory_space<vmem>>, %arg2: memref<128x128xbf16, #tpu.memory_space<vmem>>, %arg3: memref<128x1xf32, #tpu.memory_space<vmem>>, %arg4: memref<128x128xbf16, #tpu.memory_space<vmem>>) attributes {dimension_semantics = [#tpu.dimension_semantics<parallel>], iteration_bounds = array<i64: 2>, scalar_prefetch = 0 : i64, scratch_operands = 0 : i64, tpu.core_type = #tpu.core_type<tc>, window_params = [{transform_indices = @transform_0, window_bounds = array<i64: 128, 128>}, {pipeline_mode = #tpu.pipeline_mode<synchronous>, transform_indices = @transform_1, window_bounds = array<i64: 128, 128>}, {transform_indices = @transform_2, window_bounds = array<i64: 128, 1>}, {transform_indices = @transform_3, window_bounds = array<i64: 128, 128>}]} {
    %c0 = arith.constant 0 : index
    %c0_0 = arith.constant 0 : index
    %0 = vector.load %arg1[%c0, %c0_0] : memref<128x128xbf16, #tpu.memory_space<vmem>>, vector<128x128xbf16>
    %c0_1 = arith.constant 0 : index
    %c0_2 = arith.constant 0 : index
    %1 = vector.load %arg2[%c0_1, %c0_2] : memref<128x128xbf16, #tpu.memory_space<vmem>>, vector<128x128xbf16>
    %cst = arith.constant dense<0.000000e+00> : vector<128x128xf32>
    %2 = tpu.matmul %0, %1, %cst {dimension_numbers = #tpu.dot_dimension_numbers<[1], [0], [0], [1], [0, 0, 1, 1], [], []>} : vector<128x128xbf16>, vector<128x128xbf16>, vector<128x128xf32> -> vector<128x128xf32>
    %c0_3 = arith.constant 0 : index
    %c0_4 = arith.constant 0 : index
    %3 = vector.load %arg3[%c0_3, %c0_4] : memref<128x1xf32, #tpu.memory_space<vmem>>, vector<128x1xf32>
    %4 = vector.broadcast %3 : vector<128x1xf32> to vector<128x128xf32>
    %5 = arith.mulf %4, %2 : vector<128x128xf32>
    %6 = arith.truncf %5 : vector<128x128xf32> to vector<128x128xbf16>
    %c0_5 = arith.constant 0 : index
    %c0_6 = arith.constant 0 : index
    %7 = vector.load %arg4[%c0_5, %c0_6] : memref<128x128xbf16, #tpu.memory_space<vmem>>, vector<128x128xbf16>
    tpu.vector_store %arg4[%c0_5, %c0_6], %6 {strides = array<i32>} : memref<128x128xbf16, #tpu.memory_space<vmem>>, vector<128x128xbf16>,
    return
  }
  func.func @transform_0(%arg0: i32) -> (i32, i32) {
    %c0_i32 = arith.constant 0 : i32
    %c0_i32_0 = arith.constant 0 : i32
    return %arg0, %c0_i32 : i32, i32
  }
  func.func @transform_1(%arg0: i32) -> (i32, i32) {
    %c0_i32 = arith.constant 0 : i32
    %c0_i32_0 = arith.constant 0 : i32
    %c0_i32_1 = arith.constant 0 : i32
    return %c0_i32, %c0_i32_0 : i32, i32
  }
  func.func @transform_2(%arg0: i32) -> (i32, i32) {
    %c0_i32 = arith.constant 0 : i32
    %c0_i32_0 = arith.constant 0 : i32
    return %arg0, %c0_i32 : i32, i32
  }
  func.func @transform_3(%arg0: i32) -> (i32, i32) {
    %c0_i32 = arith.constant 0 : i32
    %c0_i32_0 = arith.constant 0 : i32
    return %arg0, %c0_i32 : i32, i32
  }
}

module attributes {stable_mosaic.version = 11 : i64} {
  func.func @gcn_layer1_kernel(%arg0: i32, %arg1: memref<128x256xi8, #tpu.memory_space<vmem>>, %arg2: memref<256x128xbf16, #tpu.memory_space<vmem>>, %arg3: memref<128x1xf32, #tpu.memory_space<vmem>>, %arg4: memref<1x128xf32, #tpu.memory_space<vmem>>, %arg5: memref<128x128xbf16, #tpu.memory_space<vmem>>, %arg6: memref<128x128xbf16, #tpu.memory_space<vmem>>) attributes {dimension_semantics = [#tpu.dimension_semantics<parallel>], iteration_bounds = array<i64: 2>, scalar_prefetch = 0 : i64, scratch_operands = 0 : i64, tpu.core_type = #tpu.core_type<tc>, window_params = [{transform_indices = @transform_0, window_bounds = array<i64: 128, 256>}, {pipeline_mode = #tpu.pipeline_mode<synchronous>, transform_indices = @transform_1, window_bounds = array<i64: 256, 128>}, {transform_indices = @transform_2, window_bounds = array<i64: 128, 1>}, {pipeline_mode = #tpu.pipeline_mode<synchronous>, transform_indices = @transform_3, window_bounds = array<i64: 1, 128>}, {pipeline_mode = #tpu.pipeline_mode<synchronous>, transform_indices = @transform_4, window_bounds = array<i64: 128, 128>}, {transform_indices = @transform_5, window_bounds = array<i64: 128, 128>}]} {
    %c0 = arith.constant 0 : index
    %c0_0 = arith.constant 0 : index
    %0 = vector.load %arg1[%c0, %c0_0] : memref<128x256xi8, #tpu.memory_space<vmem>>, vector<128x256xi8>
    %1 = arith.sitofp %0 : vector<128x256xi8> to vector<128x256xbf16>
    %c0_1 = arith.constant 0 : index
    %c0_2 = arith.constant 0 : index
    %2 = vector.load %arg2[%c0_1, %c0_2] : memref<256x128xbf16, #tpu.memory_space<vmem>>, vector<256x128xbf16>
    %cst = arith.constant dense<0.000000e+00> : vector<128x128xf32>
    %3 = tpu.matmul %1, %2, %cst {dimension_numbers = #tpu.dot_dimension_numbers<[1], [0], [0], [1], [0, 0, 1, 1], [], []>} : vector<128x256xbf16>, vector<256x128xbf16>, vector<128x128xf32> -> vector<128x128xf32>
    %c0_3 = arith.constant 0 : index
    %c0_4 = arith.constant 0 : index
    %4 = vector.load %arg3[%c0_3, %c0_4] : memref<128x1xf32, #tpu.memory_space<vmem>>, vector<128x1xf32>
    %5 = vector.broadcast %4 : vector<128x1xf32> to vector<128x128xf32>
    %6 = arith.mulf %5, %3 : vector<128x128xf32>
    %c0_5 = arith.constant 0 : index
    %c0_6 = arith.constant 0 : index
    %7 = vector.load %arg4[%c0_5, %c0_6] : memref<1x128xf32, #tpu.memory_space<vmem>>, vector<1x128xf32>
    %8 = vector.broadcast %7 : vector<1x128xf32> to vector<128x128xf32>
    %9 = arith.addf %6, %8 : vector<128x128xf32>
    %cst_7 = arith.constant 0.000000e+00 : f32
    %10 = vector.broadcast %cst_7 : f32 to vector<128x128xf32>
    %11 = arith.cmpf ogt, %9, %10 : vector<128x128xf32>
    %cst_8 = arith.constant 0.00999999977 : f32
    %12 = vector.broadcast %cst_8 : f32 to vector<128x128xf32>
    %13 = arith.mulf %12, %9 : vector<128x128xf32>
    %14 = arith.select %11, %9, %13 : vector<128x128xi1>, vector<128x128xf32>
    %15 = arith.truncf %14 : vector<128x128xf32> to vector<128x128xbf16>
    %c0_9 = arith.constant 0 : index
    %c0_10 = arith.constant 0 : index
    %16 = vector.load %arg5[%c0_9, %c0_10] : memref<128x128xbf16, #tpu.memory_space<vmem>>, vector<128x128xbf16>
    %cst_11 = arith.constant dense<0.000000e+00> : vector<128x128xf32>
    %17 = tpu.matmul %15, %16, %cst_11 {dimension_numbers = #tpu.dot_dimension_numbers<[1], [0], [0], [1], [0, 0, 1, 1], [], []>} : vector<128x128xbf16>, vector<128x128xbf16>, vector<128x128xf32> -> vector<128x128xf32>
    %18 = vector.broadcast %4 : vector<128x1xf32> to vector<128x128xf32>
    %19 = arith.mulf %18, %17 : vector<128x128xf32>
    %20 = arith.truncf %19 : vector<128x128xf32> to vector<128x128xbf16>
    %c0_12 = arith.constant 0 : index
    %c0_13 = arith.constant 0 : index
    %21 = vector.load %arg6[%c0_12, %c0_13] : memref<128x128xbf16, #tpu.memory_space<vmem>>, vector<128x128xbf16>
    tpu.vector_store %arg6[%c0_12, %c0_13], %20 {strides = array<i32>} : memref<128x128xbf16, #tpu.memory_space<vmem>>, vector<128x128xbf16>,
    return
  }
  func.func @transform_0(%arg0: i32) -> (i32, i32) {
    %c0_i32 = arith.constant 0 : i32
    %c0_i32_0 = arith.constant 0 : i32
    return %arg0, %c0_i32 : i32, i32
  }
  func.func @transform_1(%arg0: i32) -> (i32, i32) {
    %c0_i32 = arith.constant 0 : i32
    %c0_i32_0 = arith.constant 0 : i32
    %c0_i32_1 = arith.constant 0 : i32
    return %c0_i32, %c0_i32_0 : i32, i32
  }
  func.func @transform_2(%arg0: i32) -> (i32, i32) {
    %c0_i32 = arith.constant 0 : i32
    %c0_i32_0 = arith.constant 0 : i32
    return %arg0, %c0_i32 : i32, i32
  }
  func.func @transform_3(%arg0: i32) -> (i32, i32) {
    %c0_i32 = arith.constant 0 : i32
    %c0_i32_0 = arith.constant 0 : i32
    %c0_i32_1 = arith.constant 0 : i32
    return %c0_i32, %c0_i32_0 : i32, i32
  }
  func.func @transform_4(%arg0: i32) -> (i32, i32) {
    %c0_i32 = arith.constant 0 : i32
    %c0_i32_0 = arith.constant 0 : i32
    %c0_i32_1 = arith.constant 0 : i32
    return %c0_i32, %c0_i32_0 : i32, i32
  }
  func.func @transform_5(%arg0: i32) -> (i32, i32) {
    %c0_i32 = arith.constant 0 : i32
    %c0_i32_0 = arith.constant 0 : i32
    return %arg0, %c0_i32 : i32, i32
  }
}

module attributes {stable_mosaic.version = 11 : i64} {
  func.func @gcn_layer2_kernel(%arg0: i32, %arg1: memref<128x256xi8, #tpu.memory_space<vmem>>, %arg2: memref<256x128xbf16, #tpu.memory_space<vmem>>, %arg3: memref<128x1xf32, #tpu.memory_space<vmem>>, %arg4: memref<1x128xf32, #tpu.memory_space<vmem>>, %arg5: memref<128x128xf32, #tpu.memory_space<vmem>>) attributes {dimension_semantics = [#tpu.dimension_semantics<parallel>], iteration_bounds = array<i64: 2>, scalar_prefetch = 0 : i64, scratch_operands = 0 : i64, tpu.core_type = #tpu.core_type<tc>, window_params = [{transform_indices = @transform_0, window_bounds = array<i64: 128, 256>}, {pipeline_mode = #tpu.pipeline_mode<synchronous>, transform_indices = @transform_1, window_bounds = array<i64: 256, 128>}, {transform_indices = @transform_2, window_bounds = array<i64: 128, 1>}, {pipeline_mode = #tpu.pipeline_mode<synchronous>, transform_indices = @transform_3, window_bounds = array<i64: 1, 128>}, {transform_indices = @transform_4, window_bounds = array<i64: 128, 128>}]} {
    %c0 = arith.constant 0 : index
    %c0_0 = arith.constant 0 : index
    %0 = vector.load %arg1[%c0, %c0_0] : memref<128x256xi8, #tpu.memory_space<vmem>>, vector<128x256xi8>
    %1 = arith.sitofp %0 : vector<128x256xi8> to vector<128x256xbf16>
    %c0_1 = arith.constant 0 : index
    %c0_2 = arith.constant 0 : index
    %2 = vector.load %arg2[%c0_1, %c0_2] : memref<256x128xbf16, #tpu.memory_space<vmem>>, vector<256x128xbf16>
    %cst = arith.constant dense<0.000000e+00> : vector<128x128xf32>
    %3 = tpu.matmul %1, %2, %cst {dimension_numbers = #tpu.dot_dimension_numbers<[1], [0], [0], [1], [0, 0, 1, 1], [], []>} : vector<128x256xbf16>, vector<256x128xbf16>, vector<128x128xf32> -> vector<128x128xf32>
    %c0_3 = arith.constant 0 : index
    %c0_4 = arith.constant 0 : index
    %4 = vector.load %arg3[%c0_3, %c0_4] : memref<128x1xf32, #tpu.memory_space<vmem>>, vector<128x1xf32>
    %5 = vector.broadcast %4 : vector<128x1xf32> to vector<128x128xf32>
    %6 = arith.mulf %5, %3 : vector<128x128xf32>
    %c0_5 = arith.constant 0 : index
    %c0_6 = arith.constant 0 : index
    %7 = vector.load %arg4[%c0_5, %c0_6] : memref<1x128xf32, #tpu.memory_space<vmem>>, vector<1x128xf32>
    %8 = vector.broadcast %7 : vector<1x128xf32> to vector<128x128xf32>
    %9 = arith.addf %6, %8 : vector<128x128xf32>
    %10 = tpu.iota {dimensions = array<i32: 1>} : vector<128x128xi32>
    %c8_i32 = arith.constant 8 : i32
    %11 = vector.broadcast %c8_i32 : i32 to vector<128x128xi32>
    %12 = arith.cmpi slt, %10, %11 : vector<128x128xi32>
    %cst_7 = arith.constant -1.000000e+30 : f32
    %13 = vector.broadcast %cst_7 : f32 to vector<128x128xf32>
    %14 = arith.select %12, %9, %13 : vector<128x128xi1>, vector<128x128xf32>
    %cst_8 = arith.constant dense<0xFF800000> : vector<128xf32>
    %15 = vector.multi_reduction <maximumf>, %14, %cst_8 [1] : vector<128x128xf32> to vector<128xf32>
    %16 = vector.shape_cast %15 : vector<128xf32> to vector<128x1xf32>
    %17 = vector.broadcast %16 : vector<128x1xf32> to vector<128x128xf32>
    %18 = arith.subf %14, %17 : vector<128x128xf32>
    %19 = math.exp %18 : vector<128x128xf32>
    %cst_9 = arith.constant dense<0.000000e+00> : vector<128xf32>
    %20 = vector.multi_reduction <add>, %19, %cst_9 [1] : vector<128x128xf32> to vector<128xf32>
    %21 = vector.shape_cast %20 : vector<128xf32> to vector<128x1xf32>
    %22 = math.log %21 : vector<128x1xf32>
    %23 = vector.broadcast %22 : vector<128x1xf32> to vector<128x128xf32>
    %24 = arith.subf %18, %23 : vector<128x128xf32>
    %c0_10 = arith.constant 0 : index
    %c0_11 = arith.constant 0 : index
    %25 = vector.load %arg5[%c0_10, %c0_11] : memref<128x128xf32, #tpu.memory_space<vmem>>, vector<128x128xf32>
    tpu.vector_store %arg5[%c0_10, %c0_11], %24 {strides = array<i32>} : memref<128x128xf32, #tpu.memory_space<vmem>>, vector<128x128xf32>,
    return
  }
  func.func @transform_0(%arg0: i32) -> (i32, i32) {
    %c0_i32 = arith.constant 0 : i32
    %c0_i32_0 = arith.constant 0 : i32
    return %arg0, %c0_i32 : i32, i32
  }
  func.func @transform_1(%arg0: i32) -> (i32, i32) {
    %c0_i32 = arith.constant 0 : i32
    %c0_i32_0 = arith.constant 0 : i32
    %c0_i32_1 = arith.constant 0 : i32
    return %c0_i32, %c0_i32_0 : i32, i32
  }
  func.func @transform_2(%arg0: i32) -> (i32, i32) {
    %c0_i32 = arith.constant 0 : i32
    %c0_i32_0 = arith.constant 0 : i32
    return %arg0, %c0_i32 : i32, i32
  }
  func.func @transform_3(%arg0: i32) -> (i32, i32) {
    %c0_i32 = arith.constant 0 : i32
    %c0_i32_0 = arith.constant 0 : i32
    %c0_i32_1 = arith.constant 0 : i32
    return %c0_i32, %c0_i32_0 : i32, i32
  }
  func.func @transform_4(%arg0: i32) -> (i32, i32) {
    %c0_i32 = arith.constant 0 : i32
    %c0_i32_0 = arith.constant 0 : i32
    return %arg0, %c0_i32 : i32, i32
  }
}

</mosaic_0001>

<bundles_post_ra>
// kernel: mynet_forward.3
= control target key start
LH: loop header
LB: loop body
LE: loop exit
PB: predicated region body
PF: predicated region fallthrough
CT: control target
= control target key end

     0   :  { %s910_s12 = smov 0   ;;  %s1000_s0 = inlined_call_operand.vmem [shape: bf16[256,128], index: 0, kind: input, shape index: {}]   ;;  %s1001_s1 = inlined_call_operand.vmem [shape: bf16[128,128], index: 1, kind: input, shape index: {}]   ;;  %s1002_s2 = inlined_call_operand.vmem [shape: f32[256,1], index: 2, kind: input, shape index: {}]   ;;  %s1003_s3 = inlined_call_operand.vmem [shape: bf16[256,128], index: 3, kind: output, shape index: {}]  }
   0x1 LB: > { %s682_s13 = sadd.s32 4294967295, %s887_s12   ;;  %p686_p0 = scmp.ge.s32.totalorder %s887_s12, 1  ;;  %s887_s12 = sphi %s910_s12, %s13_s12  }
   0x2   : > { %p149_p1 = scmp.lt.s32.totalorder %s887_s12, 3 }
   0x4   : > { %p150_p2 = pnand %p686_p0, %p149_p1 }
   0x5   : > { %s687_s16 = sshll.u32 (!%p150_p2), %s682_s13, 4 }
   0x6   : > { %153 = sbr.rel (%p150_p2) target bundleno = 256 (0x100), region = 32  ;;  %p179_p3 = scmp.lt.s32.totalorder (!%p150_p2), %s687_s16, 31 }
   0xb   : > { %v865_v0 = vld [vmem:[%s1001_s1 + $0x38] sm:$0xff]   ;;  %v866_v1 = vld [vmem:[%s1001_s1 + $0x30] sm:$0xff]   ;;  %s1005_s16 = smov (!%p179_p3, %s687_s16), 31  ;;  %v867_v2 = vld [vmem:[%s1001_s1 + $0x28] sm:$0xff]   ;;  %v889_v3 = vmov 0  }
   0xc   : > { %806 = vmatprep.subr.bf16.mxu0 %v865_v0  ;;  %838 = vmatprep.subr.bf16.mxu1 %v865_v0  ;;  %s688_s21 = sshll.u32 %s1005_s16, 2  ;;  %v868_v4 = vld [vmem:[%s1001_s1 + $0x20] sm:$0xff]   ;;  %s690_s27 = sshll.u32 %s1005_s16, 3  ;;  %v869_v7 = vld [vmem:[%s1001_s1 + $0x18] sm:$0xff]   ;;  %v870_v8 = vld [vmem:[%s1001_s1 + $0x10] sm:$0xff]  }
   0xd   : > { %807 = vmatpush3.bf16.msra.mxu0 %v865_v0  ;;  %846 = vmatpush3.bf16.msra.mxu1 %v865_v0  ;;  %s935_s24 = scalar_lea.vmem %s1000_s0, %s688_s21  ;;  %s949_s5 = scalar_lea.vmem %s1002_s2, %s690_s27  ;;  %v871_v13 = vld [vmem:[%s1001_s1 + $0x8] sm:$0xff]   ;;  %v872_v16 = vld [vmem:[%s1001_s1] sm:$0xff]  }
   0xe   : > { %808 = vmatprep.subr.bf16.mxu0 %v866_v1  ;;  %839 = vmatprep.subr.bf16.mxu1 %v866_v1  ;;  %v873_v5 = vld [vmem:[%s935_s24] sm:$0xff]   ;;  %v424_v9 = vld [vmem:[%s949_s5 + $0x10] sm:$0xff]  ;;  %v425_v11 = vld [vmem:[%s949_s5 + $0x18] sm:$0xff]  ;;  %s987_s15 = scalar_lea.vmem %s1003_s3, %s688_s21 }
   0xf   : > { %864 = vset.pattern.permute.xlu1 %v889_v3  ;;  %863 = vset.pattern.permute.xlu0 %v889_v3  ;;  %v874_v6 = vld [vmem:[%s935_s24 + $0x20] sm:$0xff]   ;;  %v423_v12 = vld [vmem:[%s949_s5 + $0x8] sm:$0xff]  ;;  %v429_v17 = vld [vmem:[%s949_s5 + $0x38] sm:$0xff] }
  0x10   : > { %822 = vmatprep.mubr.bf16.mxu0 %v873_v5  ;;  %830 = vmatprep.mubr.bf16.mxu1 %v874_v6  ;;  %v422_v10 = vld [vmem:[%s949_s5] sm:$0xff]  ;;  %v427_v14 = vld [vmem:[%s949_s5 + $0x28] sm:$0xff]  ;;  %v428_v18 = vld [vmem:[%s949_s5 + $0x30] sm:$0xff] }
  0x11   : > { %809 = vmatpush3.bf16.msra.mxu0 %v866_v1  ;;  %847 = vmatpush3.bf16.msra.mxu1 %v866_v1  ;;  %v426_v15 = vld [vmem:[%s949_s5 + $0x20] sm:$0xff]  ;;  %v875_v19 = vld [vmem:[%s935_s24 + $0x8] sm:$0xff]   ;;  %v877_v23 = vld [vmem:[%s935_s24 + $0x10] sm:$0xff]  }
  0x12   : > { %810 = vmatprep.subr.bf16.mxu0 %v867_v2  ;;  %840 = vmatprep.subr.bf16.mxu1 %v867_v2  ;;  %v876_v20 = vld [vmem:[%s935_s24 + $0x28] sm:$0xff]   ;;  %v430_v22 = vld [vmem:[%s949_s5 + $0x40] sm:$0xff]  ;;  %v878_v24 = vld [vmem:[%s935_s24 + $0x30] sm:$0xff]  }
  0x13   : > { %450 = vperm.xlu1 %864, %v424_v9   ;;  %440 = vperm.xlu0 %863, %v422_v10   ;;  %v431_v21 = vld [vmem:[%s949_s5 + $0x48] sm:$0xff]  ;;  %v433_v25 = vld [vmem:[%s949_s5 + $0x58] sm:$0xff]  ;;  %v432_v26 = vld [vmem:[%s949_s5 + $0x50] sm:$0xff] }
  0x14   : > { %v879_v27 = vld [vmem:[%s935_s24 + $0x18] sm:$0xff]   ;;  %v435_v29 = vld [vmem:[%s949_s5 + $0x68] sm:$0xff]  ;;  %v434_v30 = vld [vmem:[%s949_s5 + $0x60] sm:$0xff] }
  0x15   : > { %811 = vmatpush3.bf16.msra.mxu0 %v867_v2  ;;  %848 = vmatpush3.bf16.msra.mxu1 %v867_v2  ;;  %v880_v28 = vld [vmem:[%s935_s24 + $0x38] sm:$0xff]   ;;  %v436_v32 = vld [vmem:[%s949_s5 + $0x70] sm:$0xff] }
  0x16   : > { %812 = vmatprep.subr.bf16.mxu0 %v868_v4  ;;  %841 = vmatprep.subr.bf16.mxu1 %v868_v4  ;;  %v437_v31 = vld [vmem:[%s949_s5 + $0x78] sm:$0xff] }
  0x17   : > { %455 = vperm.xlu1 %864, %v425_v11   ;;  %445 = vperm.xlu0 %863, %v423_v12  }
  0x19   : > { %813 = vmatpush3.bf16.msra.mxu0 %v868_v4  ;;  %849 = vmatpush3.bf16.msra.mxu1 %v868_v4 }
  0x1a   : > { %814 = vmatprep.subr.bf16.mxu0 %v869_v7  ;;  %842 = vmatprep.subr.bf16.mxu1 %v869_v7 }
  0x1b   : > { %465 = vperm.xlu1 %864, %v427_v14   ;;  %460 = vperm.xlu0 %863, %v426_v15  }
  0x1d   : > { %815 = vmatpush3.bf16.msra.mxu0 %v869_v7  ;;  %850 = vmatpush3.bf16.msra.mxu1 %v869_v7 }
  0x1e   : > { %816 = vmatprep.subr.bf16.mxu0 %v870_v8  ;;  %843 = vmatprep.subr.bf16.mxu1 %v870_v8 }
  0x1f   : > { %475 = vperm.xlu1 %864, %v429_v17   ;;  %470 = vperm.xlu0 %863, %v428_v18  }
  0x21   : > { %817 = vmatpush3.bf16.msra.mxu0 %v870_v8  ;;  %851 = vmatpush3.bf16.msra.mxu1 %v870_v8 }
  0x22   : > { %818 = vmatprep.subr.bf16.mxu0 %v871_v13  ;;  %844 = vmatprep.subr.bf16.mxu1 %v871_v13 }
  0x23   : > { %485 = vperm.xlu1 %864, %v431_v21   ;;  %480 = vperm.xlu0 %863, %v430_v22  }
  0x25   : > { %819 = vmatpush3.bf16.msra.mxu0 %v871_v13  ;;  %852 = vmatpush3.bf16.msra.mxu1 %v871_v13 }
  0x26   : > { %820 = vmatprep.subr.bf16.mxu0 %v872_v16  ;;  %845 = vmatprep.subr.bf16.mxu1 %v872_v16 }
  0x27   : > { %495 = vperm.xlu1 %864, %v433_v25   ;;  %490 = vperm.xlu0 %863, %v432_v26  }
  0x29   : > { %821 = vmatpush3.bf16.msra.mxu0 %v872_v16  ;;  %853 = vmatpush3.bf16.msra.mxu1 %v872_v16 }
  0x2b   : > { %505 = vperm.xlu1 %864, %v435_v29   ;;  %500 = vperm.xlu0 %863, %v434_v30  }
  0x2c   : > { %823 = vmatmul.mubr.bf16.vlgmr.msra.gmra.mxu0 %v875_v19  ;;  %831 = vmatmul.mubr.bf16.vlgmr.msra.gmra.mxu1 %v876_v20 }
  0x2d   : > { %826 = vmatprep.mubr.bf16.mxu0 %v877_v23  ;;  %834 = vmatprep.mubr.bf16.mxu1 %v878_v24 }
  0x2f   : > { %515 = vperm.xlu1 %864, %v437_v31   ;;  %510 = vperm.xlu0 %863, %v436_v32  }
  0x34   : > { %827 = vmatmul.mubr.bf16.gmra.mxu0 %v879_v27  ;;  %835 = vmatmul.mubr.bf16.gmra.mxu1 %v880_v28 }
  0x8e   : > { %v451_v33 = vpop.permute.xlu1 %450  ;;  %v441_v34 = vpop.permute.xlu0 %440 }
  0x92   : > { %v456_v35 = vpop.permute.xlu1 %455  ;;  %v446_v36 = vpop.permute.xlu0 %445 }
  0x96   : > { %v466_v37 = vpop.permute.xlu1 %465  ;;  %v461_v38 = vpop.permute.xlu0 %460 }
  0x9a   : > { %v476_v39 = vpop.permute.xlu1 %475  ;;  %v471_v40 = vpop.permute.xlu0 %470 }
  0x9e   : > { %v486_v41 = vpop.permute.xlu1 %485  ;;  %v481_v42 = vpop.permute.xlu0 %480 }
  0xa2   : > { %v496_v43 = vpop.permute.xlu1 %495  ;;  %v491_v44 = vpop.permute.xlu0 %490 }
  0xa6   : > { %v506_v51 = vpop.permute.xlu1 %505  ;;  %v501_v52 = vpop.permute.xlu0 %500 }
  0xaa   : > { %v516_v7 = vpop.permute.xlu1 %515  ;;  %v511_v8 = vpop.permute.xlu0 %510 }
  0xec   : > { %v824_v45 = vpop.f32.mrf.mxu0  ;;  %v832_v46 = vpop.f32.mrf.mxu1 }
  0xed   : > { %v520_v53 = vmul.f32 %v824_v45, %v451_v33  ;;  %v528_v54 = vmul.f32 %v832_v46, %v491_v44 }
  0xee   : > { %v359_v47 = vpop.f32.mrf.mxu0  ;;  %v391_v48 = vpop.f32.mrf.mxu1 }
  0xef   : > { %v518_v57 = vmul.f32 %v441_v34, %v359_v47  ;;  %v526_v58 = vmul.f32 %v481_v42, %v391_v48 }
  0xf0   : > { %v825_v49 = vpop.f32.mrf.mxu0  ;;  %v833_v50 = vpop.f32.mrf.mxu1 }
  0xf1   : > { %v521_v55 = vmul.f32 %v825_v49, %v456_v35  ;;  %v529_v56 = vmul.f32 %v833_v50, %v496_v43 }
  0xf2   : > { %v362_v59 = vpop.f32.mrf.mxu0  ;;  %v394_v60 = vpop.f32.mrf.mxu1 }
  0xf3   : > { %v751_v61 = vpack.c.bf16 %v521_v55, %v520_v53  ;;  %v771_v62 = vpack.c.bf16 %v529_v56, %v528_v54  ;;  %v519_v63 = vmul.f32 %v446_v36, %v362_v59  ;;  %v527_v0 = vmul.f32 %v486_v41, %v394_v60 }
  0xf4   : > { %v828_v1 = vpop.f32.mrf.mxu0  ;;  %v836_v2 = vpop.f32.mrf.mxu1 }
  0xf5   : > { %783 = vst [vmem:[%s987_s15 + $0x8] sm:$0xff] %v751_v61   ;;  %787 = vst [vmem:[%s987_s15 + $0x28] sm:$0xff] %v771_v62   ;;  %v746_v3 = vpack.c.bf16 %v519_v63, %v518_v57  ;;  %v766_v4 = vpack.c.bf16 %v527_v0, %v526_v58  ;;  %v524_v11 = vmul.f32 %v828_v1, %v471_v40 }
  0xf6   : > { %v375_v5 = vpop.f32.mrf.mxu0  ;;  %v407_v6 = vpop.f32.mrf.mxu1  ;;  %v532_v12 = vmul.f32 %v836_v2, %v511_v8 }
  0xf7   : > { %747 = vst [vmem:[%s987_s15] sm:$0xff] %v746_v3   ;;  %786 = vst [vmem:[%s987_s15 + $0x20] sm:$0xff] %v766_v4   ;;  %v522_v15 = vmul.f32 %v461_v38, %v375_v5  ;;  %v530_v16 = vmul.f32 %v501_v52, %v407_v6 }
  0xf8   : > { %v829_v9 = vpop.f32.mrf.mxu0  ;;  %v837_v10 = vpop.f32.mrf.mxu1 }
  0xf9   : > { %v525_v13 = vmul.f32 %v829_v9, %v476_v39  ;;  %v533_v14 = vmul.f32 %v837_v10, %v516_v7 }
  0xfa   : > { %v378_v17 = vpop.f32.mrf.mxu0  ;;  %v410_v18 = vpop.f32.mrf.mxu1 }
  0xfb   : > { %v761_v19 = vpack.c.bf16 %v525_v13, %v524_v11  ;;  %v781_v20 = vpack.c.bf16 %v533_v14, %v532_v12  ;;  %v523_v21 = vmul.f32 %v466_v37, %v378_v17  ;;  %v531_v22 = vmul.f32 %v506_v51, %v410_v18 }
  0xfd   : > { %785 = vst [vmem:[%s987_s15 + $0x18] sm:$0xff] %v761_v19   ;;  %789 = vst [vmem:[%s987_s15 + $0x38] sm:$0xff] %v781_v20   ;;  %v756_v23 = vpack.c.bf16 %v523_v21, %v522_v15  ;;  %v776_v24 = vpack.c.bf16 %v531_v22, %v530_v16 }
  0xff   : > { %784 = vst [vmem:[%s987_s15 + $0x10] sm:$0xff] %v756_v23   ;;  %788 = vst [vmem:[%s987_s15 + $0x30] sm:$0xff] %v776_v24  }
 0x100 PF: > { %s13_s12 = sadd.s32 1, %s887_s12  }
 0x101   : > { %p10_p4 = scmp.ge.s32.totalorder %s13_s12, 4  }
 0x103   :  { %12 = sbr.rel (!%p10_p4) target bundleno = 1 (0x1), region = 65 }

// kernel: mynet_forward.4
= control target key start
LH: loop header
LB: loop body
LE: loop exit
PB: predicated region body
PF: predicated region fallthrough
CT: control target
= control target key end

     0   :  { %s1324_s18 = smov 0   ;;  %s1539_s0 = inlined_call_operand.vmem [shape: s8[256,256], index: 0, kind: input, shape index: {}]   ;;  %s1540_s1 = inlined_call_operand.vmem [shape: bf16[256,128], index: 1, kind: input, shape index: {}]   ;;  %s1541_s2 = inlined_call_operand.vmem [shape: f32[256,1], index: 2, kind: input, shape index: {}]   ;;  %s1542_s3 = inlined_call_operand.vmem [shape: f32[1,128], index: 3, kind: input, shape index: {}]   ;;  %s1543_s4 = inlined_call_operand.vmem [shape: bf16[128,128], index: 4, kind: input, shape index: {}]   ;;  %s1544_s5 = inlined_call_operand.vmem [shape: bf16[256,128], index: 5, kind: output, shape index: {}]  }
   0x1 LB: > { %s1019_s19 = sadd.s32 4294967295, %s1291_s18   ;;  %p1023_p0 = scmp.ge.s32.totalorder %s1291_s18, 1  ;;  %s1291_s18 = sphi %s1324_s18, %s15_s18  }
   0x2   : > { %p200_p1 = scmp.lt.s32.totalorder %s1291_s18, 3 }
   0x4   : > { %p201_p2 = pnand %p1023_p0, %p200_p1 }
   0x5   : > { %s1024_s22 = sshll.u32 (!%p201_p2), %s1019_s19, 2  ;;  %s1027_s6 = sshll.u32 (!%p201_p2), %s1019_s19, 4 }
   0x6   : > { %204 = sbr.rel (%p201_p2) target bundleno = 514 (0x202), region = 40  ;;  %p235_p3 = scmp.lt.s32.totalorder (!%p201_p2), %s1024_s22, 7 }
   0x7   : > { %p242_p4 = scmp.lt.s32.totalorder (!%p201_p2), %s1027_s6, 31 }
   0xb   : > { %v1261_v0 = vld [vmem:[%s1540_s1 + $0x78] sm:$0xff]   ;;  %v1263_v2 = vld [vmem:[%s1540_s1 + $0x70] sm:$0xff]   ;;  %v1293_v4 = vmov 0   ;;  %v1265_v5 = vld [vmem:[%s1540_s1 + $0x68] sm:$0xff]   ;;  %s1546_s22 = smov (!%p235_p3, %s1024_s22), 7  ;;  %s1548_s6 = smov (!%p242_p4, %s1027_s6), 31 }
   0xc   : > { %v1262_v1 = vld [vmem:[%s1540_s1 + $0x38] sm:$0xff]   ;;  %1138 = vmatprep.subr.bf16.mxu0 %v1261_v0  ;;  %v1264_v3 = vld [vmem:[%s1540_s1 + $0x30] sm:$0xff]   ;;  %1259 = vset.pattern.permute.xlu0 %v1293_v4  ;;  %v1266_v6 = vld [vmem:[%s1540_s1 + $0x28] sm:$0xff]   ;;  %s1074_s11 = sshll.u32 %s1546_s22, 4  ;;  %s1028_s16 = sshll.u32 %s1548_s6, 3 }
   0xd   : > { %1139 = vmatpush3.bf16.msra.mxu0 %v1262_v1  ;;  %1260 = vset.pattern.permute.xlu1 %v1293_v4  ;;  %v1267_v7 = vld [vmem:[%s1540_s1 + $0x60] sm:$0xff]   ;;  %v1269_v9 = vld [vmem:[%s1540_s1 + $0x58] sm:$0xff]   ;;  %s1365_s20 = scalar_lea.vmem %s1539_s0, %s1074_s11  ;;  %s1373_s25 = scalar_lea.vmem %s1541_s2, %s1028_s16  ;;  %v1271_v11 = vld [vmem:[%s1540_s1 + $0x50] sm:$0xff]  }
   0xe   : > { %1140 = vmatprep.subr.bf16.mxu0 %v1263_v2  ;;  %v1268_v8 = vld [vmem:[%s1540_s1 + $0x20] sm:$0xff]   ;;  %v1270_v10 = vld [vmem:[%s1540_s1 + $0x18] sm:$0xff]   ;;  %v255_v12 = vld [vmem:[%s1365_s20 + $0x8] sm:$0xff]  ;;  %s1030_s9 = sshll.u32 %s1548_s6, 2 }
   0xf   : > { %v263_v13 = vunpack.c.l.s8.bf16 %v255_v12  ;;  %v503_v14 = vld [vmem:[%s1373_s25] sm:$0xff]  ;;  %v1272_v15 = vld [vmem:[%s1540_s1 + $0x10] sm:$0xff]   ;;  %v1273_v17 = vld [vmem:[%s1540_s1 + $0x48] sm:$0xff]   ;;  %v265_v31 = vunpack.c.h.s8.bf16 %v255_v12  ;;  %s1513_s12 = scalar_lea.vmem %s1544_s5, %s1030_s9 }
  0x10   : > { %v505_v16 = vld [vmem:[%s1373_s25 + $0x10] sm:$0xff]  ;;  %521 = vperm.xlu0 %1259, %v503_v14   ;;  %v504_v18 = vld [vmem:[%s1373_s25 + $0x8] sm:$0xff]  ;;  %v506_v19 = vld [vmem:[%s1373_s25 + $0x18] sm:$0xff] }
  0x11   : > { %1141 = vmatpush3.bf16.msra.mxu0 %v1264_v3  ;;  %438 = vmatprep.mubr.bf16.mxu0 %v263_v13  ;;  %v1274_v20 = vld [vmem:[%s1540_s1 + $0x8] sm:$0xff]   ;;  %v1275_v21 = vld [vmem:[%s1540_s1 + $0x40] sm:$0xff]   ;;  %v1277_v24 = vld [vmem:[%s1543_s4 + $0x38] sm:$0xff]  }
  0x12   : > { %1142 = vmatprep.subr.bf16.mxu0 %v1265_v5  ;;  %531 = vperm.xlu1 %1260, %v505_v16   ;;  %v507_v22 = vld [vmem:[%s1373_s25 + $0x20] sm:$0xff]  ;;  %v508_v23 = vld [vmem:[%s1373_s25 + $0x28] sm:$0xff]  ;;  %v1278_v27 = vld [vmem:[%s1543_s4 + $0x30] sm:$0xff]  }
  0x13   : > { %v1276_v25 = vld [vmem:[%s1540_s1] sm:$0xff]   ;;  %1218 = vmatprep.subr.bf16.mxu1 %v1277_v24  ;;  %v509_v28 = vld [vmem:[%s1373_s25 + $0x30] sm:$0xff]  ;;  %v510_v30 = vld [vmem:[%s1373_s25 + $0x38] sm:$0xff] }
  0x14   : > { %526 = vperm.xlu0 %1259, %v504_v18   ;;  %v254_v26 = vld [vmem:[%s1365_s20] sm:$0xff]  ;;  %1219 = vmatpush3.bf16.msra.mxu1 %v1277_v24  ;;  %v512_v33 = vld [vmem:[%s1373_s25 + $0x48] sm:$0xff]  ;;  %v257_v34 = vld [vmem:[%s1365_s20 + $0x18] sm:$0xff] }
  0x15   : > { %1143 = vmatpush3.bf16.msra.mxu0 %v1266_v6  ;;  %1220 = vmatprep.subr.bf16.mxu1 %v1278_v27  ;;  %v262_v29 = vunpack.c.l.s8.bf16 %v254_v26  ;;  %v511_v32 = vld [vmem:[%s1373_s25 + $0x40] sm:$0xff]  ;;  %v513_v35 = vld [vmem:[%s1373_s25 + $0x50] sm:$0xff]  ;;  %v264_v36 = vunpack.c.h.s8.bf16 %v254_v26  ;;  %v514_v37 = vld [vmem:[%s1373_s25 + $0x58] sm:$0xff]  ;;  %v267_v38 = vunpack.c.l.s8.bf16 %v257_v34  ;;  %v269_v45 = vunpack.c.h.s8.bf16 %v257_v34 }
  0x16   : > { %1144 = vmatprep.subr.bf16.mxu0 %v1267_v7  ;;  %536 = vperm.xlu1 %1260, %v506_v19   ;;  %v515_v39 = vld [vmem:[%s1373_s25 + $0x60] sm:$0xff]  ;;  %v516_v40 = vld [vmem:[%s1373_s25 + $0x68] sm:$0xff]  ;;  %v256_v41 = vld [vmem:[%s1365_s20 + $0x10] sm:$0xff] }
  0x17   : > { %v517_v42 = vld [vmem:[%s1373_s25 + $0x70] sm:$0xff]  ;;  %v266_v43 = vunpack.c.l.s8.bf16 %v256_v41  ;;  %v518_v44 = vld [vmem:[%s1373_s25 + $0x78] sm:$0xff]  ;;  %v259_v46 = vld [vmem:[%s1365_s20 + $0x28] sm:$0xff]  ;;  %v268_v47 = vunpack.c.h.s8.bf16 %v256_v41 }
  0x18   : > { %541 = vperm.xlu0 %1259, %v507_v22   ;;  %1221 = vmatpush3.bf16.msra.mxu1 %v1278_v27  ;;  %v271_v48 = vunpack.c.l.s8.bf16 %v259_v46  ;;  %v258_v49 = vld [vmem:[%s1365_s20 + $0x20] sm:$0xff]  ;;  %v273_v51 = vunpack.c.h.s8.bf16 %v259_v46  ;;  %v261_v52 = vld [vmem:[%s1365_s20 + $0x38] sm:$0xff]  ;;  %v260_v55 = vld [vmem:[%s1365_s20 + $0x30] sm:$0xff] }
  0x19   : > { %1145 = vmatpush3.bf16.msra.mxu0 %v1268_v8  ;;  %v270_v50 = vunpack.c.l.s8.bf16 %v258_v49  ;;  %v272_v53 = vunpack.c.h.s8.bf16 %v258_v49  ;;  %v275_v54 = vunpack.c.l.s8.bf16 %v261_v52  ;;  %v274_v56 = vunpack.c.l.s8.bf16 %v260_v55  ;;  %v1279_v59 = vld [vmem:[%s1543_s4 + $0x28] sm:$0xff]   ;;  %v1280_v60 = vld [vmem:[%s1543_s4 + $0x20] sm:$0xff]   ;;  %v1281_v61 = vld [vmem:[%s1543_s4 + $0x18] sm:$0xff]  }
  0x1a   : > { %1146 = vmatprep.subr.bf16.mxu0 %v1269_v9  ;;  %546 = vperm.xlu1 %1260, %v508_v23   ;;  %v277_v57 = vunpack.c.h.s8.bf16 %v261_v52  ;;  %v276_v58 = vunpack.c.h.s8.bf16 %v260_v55  ;;  %v1282_v62 = vld [vmem:[%s1543_s4 + $0x10] sm:$0xff]   ;;  %v1283_v63 = vld [vmem:[%s1543_s4 + $0x8] sm:$0xff]   ;;  %v1284_v0 = vld [vmem:[%s1543_s4] sm:$0xff]  }
  0x1b   : > { %1222 = vmatprep.subr.bf16.mxu1 %v1279_v59  ;;  %v1446_v5 = vld [vmem:[%s1542_s3] ss:$0 sm:$0xff] }
  0x1c   : > { %551 = vperm.xlu0 %1259, %v509_v28   ;;  %1223 = vmatpush3.bf16.msra.mxu1 %v1279_v59 }
  0x1d   : > { %1147 = vmatpush3.bf16.msra.mxu0 %v1270_v10  ;;  %1224 = vmatprep.subr.bf16.mxu1 %v1280_v60 }
  0x1e   : > { %1148 = vmatprep.subr.bf16.mxu0 %v1271_v11  ;;  %556 = vperm.xlu1 %1260, %v510_v30  }
  0x20   : > { %561 = vperm.xlu0 %1259, %v511_v32   ;;  %1225 = vmatpush3.bf16.msra.mxu1 %v1280_v60 }
  0x21   : > { %1149 = vmatpush3.bf16.msra.mxu0 %v1272_v15  ;;  %1226 = vmatprep.subr.bf16.mxu1 %v1281_v61 }
  0x22   : > { %1150 = vmatprep.subr.bf16.mxu0 %v1273_v17  ;;  %566 = vperm.xlu1 %1260, %v512_v33  }
  0x24   : > { %571 = vperm.xlu0 %1259, %v513_v35   ;;  %1227 = vmatpush3.bf16.msra.mxu1 %v1281_v61 }
  0x25   : > { %1151 = vmatpush3.bf16.msra.mxu0 %v1274_v20  ;;  %1228 = vmatprep.subr.bf16.mxu1 %v1282_v62 }
  0x26   : > { %1152 = vmatprep.subr.bf16.mxu0 %v1275_v21  ;;  %576 = vperm.xlu1 %1260, %v514_v37  }
  0x28   : > { %581 = vperm.xlu0 %1259, %v515_v39   ;;  %1229 = vmatpush3.bf16.msra.mxu1 %v1282_v62 }
  0x29   : > { %1153 = vmatpush3.bf16.msra.mxu0 %v1276_v25  ;;  %1230 = vmatprep.subr.bf16.mxu1 %v1283_v63 }
  0x2a   : > { %586 = vperm.xlu1 %1260, %v516_v40  }
  0x2c   : > { %439 = vmatmul.mubr.bf16.vlgmr.msra.gmra.mxu0 %v262_v29  ;;  %591 = vperm.xlu0 %1259, %v517_v42  }
  0x2d   : > { %446 = vmatprep.mubr.bf16.mxu0 %v265_v31  ;;  %1231 = vmatpush3.bf16.msra.mxu1 %v1283_v63 }
  0x2e   : > { %596 = vperm.xlu1 %1260, %v518_v44   ;;  %1232 = vmatprep.subr.bf16.mxu1 %v1284_v0 }
  0x31   : > { %1233 = vmatpush3.bf16.msra.mxu1 %v1284_v0 }
  0x34   : > { %447 = vmatmul.mubr.bf16.gmra.mxu0 %v264_v36 }
  0x35   : > { %454 = vmatprep.mubr.bf16.mxu0 %v267_v38 }
  0x3c   : > { %455 = vmatmul.mubr.bf16.gmra.mxu0 %v266_v43 }
  0x3d   : > { %462 = vmatprep.mubr.bf16.mxu0 %v269_v45 }
  0x44   : > { %463 = vmatmul.mubr.bf16.gmra.mxu0 %v268_v47 }
  0x45   : > { %470 = vmatprep.mubr.bf16.mxu0 %v271_v48 }
  0x4c   : > { %471 = vmatmul.mubr.bf16.gmra.mxu0 %v270_v50 }
  0x4d   : > { %478 = vmatprep.mubr.bf16.mxu0 %v273_v51 }
  0x54   : > { %479 = vmatmul.mubr.bf16.gmra.mxu0 %v272_v53 }
  0x55   : > { %486 = vmatprep.mubr.bf16.mxu0 %v275_v54 }
  0x5c   : > { %487 = vmatmul.mubr.bf16.gmra.mxu0 %v274_v56 }
  0x5d   : > { %494 = vmatprep.mubr.bf16.mxu0 %v277_v57 }
  0x64   : > { %495 = vmatmul.mubr.bf16.gmra.mxu0 %v276_v58 }
  0x8b   : > { %v1441_v2 = vpop.permute.xlu0 %521 }
  0x8d   : > { %v1453_v14 = vpop.permute.xlu1 %531 }
  0x8f   : > { %v1449_v9 = vpop.permute.xlu0 %526 }
  0x91   : > { %v1458_v27 = vpop.permute.xlu1 %536 }
  0x93   : > { %v1462_v35 = vpop.permute.xlu0 %541 }
  0x95   : > { %v1466_v44 = vpop.permute.xlu1 %546 }
  0x97   : > { %v1470_v52 = vpop.permute.xlu0 %551 }
  0x99   : > { %v1474_v61 = vpop.permute.xlu1 %556 }
  0xec   : > { %v1154_v1 = vpop.f32.mrf.mxu0 }
  0xee   : > { %v1155_v3 = vpop.f32.mrf.mxu0 }
  0xef   : > { %v1156_v4 = vadd.f32 %v1155_v3, %v1154_v1 }
  0xf0   : > { %v1157_v6 = vpop.f32.mrf.mxu0 }
  0xf1   : > { %v599_v7 = vmul.f32 %v1156_v4, %v1441_v2 }
  0xf2   : > { %v1158_v8 = vpop.f32.mrf.mxu0 }
  0xf3   : > { %v622_v10 = vadd.f32 %v1446_v5, %v599_v7  ;;  %v1159_v11 = vadd.f32 %v1158_v8, %v1157_v6  ;;  %v1478_v7 = vpop.permute.xlu0 %561 }
  0xf4   : > { %v1160_v12 = vpop.f32.mrf.mxu0 }
  0xf5   : > { %v600_v13 = vmul.f32 %v1159_v11, %v1449_v9  ;;  %v654_v18 = vmul.f32 0.01, %v622_v10  ;;  %vm638_vm0 = vcmp.gt.f32.partialorder %v622_v10, 0.0 }
  0xf6   : > { %v1161_v15 = vpop.f32.mrf.mxu0 }
  0xf7   : > { %v623_v16 = vadd.f32 %v1446_v5, %v600_v13  ;;  %v1162_v17 = vadd.f32 %v1161_v15, %v1160_v12  ;;  %v670_v25 = vsel %vm638_vm0, %v622_v10, %v654_v18  ;;  %v1482_v18 = vpop.permute.xlu1 %566 }
  0xf8   : > { %v1163_v19 = vpop.f32.mrf.mxu0 }
  0xf9   : > { %v601_v20 = vmul.f32 %v1162_v17, %v1453_v14  ;;  %vm639_vm1 = vcmp.gt.f32.partialorder %v623_v16, 0.0  ;;  %v655_v21 = vmul.f32 0.01, %v623_v16 }
  0xfa   : > { %v1164_v22 = vpop.f32.mrf.mxu0 }
  0xfb   : > { %v624_v23 = vadd.f32 %v1446_v5, %v601_v20  ;;  %v1165_v24 = vadd.f32 %v1164_v22, %v1163_v19  ;;  %v671_v26 = vsel %vm639_vm1, %v623_v16, %v655_v21 }
  0xfc   : > { %v1166_v28 = vpop.f32.mrf.mxu0  ;;  %v686_v29 = vpack.c.bf16 %v671_v26, %v670_v25  ;;  %v1486_v26 = vpop.permute.xlu0 %571 }
  0xfd   : > { %v602_v30 = vmul.f32 %v1165_v24, %v1458_v27  ;;  %v656_v32 = vmul.f32 0.01, %v624_v23  ;;  %vm640_vm2 = vcmp.gt.f32.partialorder %v624_v23, 0.0 }
  0xfe   : > { %v1167_v31 = vpop.f32.mrf.mxu0  ;;  %1234 = vmatprep.mubr.bf16.mxu1 %v686_v29 }
  0xff   : > { %v625_v33 = vadd.f32 %v1446_v5, %v602_v30  ;;  %v1168_v34 = vadd.f32 %v1167_v31, %v1166_v28  ;;  %v672_v42 = vsel %vm640_vm2, %v624_v23, %v656_v32 }
 0x100   : > { %v1169_v36 = vpop.f32.mrf.mxu0 }
 0x101   : > { %v657_v37 = vmul.f32 0.01, %v625_v33  ;;  %v603_v38 = vmul.f32 %v1168_v34, %v1462_v35  ;;  %vm641_vm3 = vcmp.gt.f32.partialorder %v625_v33, 0.0 }
 0x102   : > { %v1170_v39 = vpop.f32.mrf.mxu0 }
 0x103   : > { %v626_v40 = vadd.f32 %v1446_v5, %v603_v38  ;;  %v1171_v41 = vadd.f32 %v1170_v39, %v1169_v36  ;;  %v673_v43 = vsel %vm641_vm3, %v625_v33, %v657_v37  ;;  %v1490_v37 = vpop.permute.xlu1 %576 }
 0x104   : > { %v1172_v45 = vpop.f32.mrf.mxu0  ;;  %v687_v46 = vpack.c.bf16 %v673_v43, %v672_v42 }
 0x105   : > { %v604_v47 = vmul.f32 %v1171_v41, %v1466_v44  ;;  %v658_v49 = vmul.f32 0.01, %v626_v40  ;;  %vm642_vm4 = vcmp.gt.f32.partialorder %v626_v40, 0.0 }
 0x106   : > { %v1173_v48 = vpop.f32.mrf.mxu0  ;;  %1235 = vmatmul.mubr.bf16.vlgmr.msra.gmra.mxu1 %v687_v46  ;;  %v1494_v46 = vpop.permute.xlu0 %581 }
 0x107   : > { %v627_v50 = vadd.f32 %v1446_v5, %v604_v47  ;;  %v1174_v51 = vadd.f32 %v1173_v48, %v1172_v45  ;;  %v674_v59 = vsel %vm642_vm4, %v626_v40, %v658_v49 }
 0x108   : > { %v1175_v53 = vpop.f32.mrf.mxu0 }
 0x109   : > { %v659_v54 = vmul.f32 0.01, %v627_v50  ;;  %v605_v55 = vmul.f32 %v1174_v51, %v1470_v52  ;;  %vm643_vm5 = vcmp.gt.f32.partialorder %v627_v50, 0.0 }
 0x10a   : > { %v1176_v56 = vpop.f32.mrf.mxu0 }
 0x10b   : > { %v628_v57 = vadd.f32 %v1446_v5, %v605_v55  ;;  %v1177_v58 = vadd.f32 %v1176_v56, %v1175_v53  ;;  %v675_v60 = vsel %vm643_vm5, %v627_v50, %v659_v54  ;;  %v1498_v56 = vpop.permute.xlu1 %586 }
 0x10c   : > { %v1178_v62 = vpop.f32.mrf.mxu0  ;;  %v688_v63 = vpack.c.bf16 %v675_v60, %v674_v59 }
 0x10d   : > { %v606_v0 = vmul.f32 %v1177_v58, %v1474_v61  ;;  %v660_v3 = vmul.f32 0.01, %v628_v57  ;;  %vm644_vm6 = vcmp.gt.f32.partialorder %v628_v57, 0.0 }
 0x10e   : > { %v1179_v1 = vpop.f32.mrf.mxu0  ;;  %1238 = vmatprep.mubr.bf16.mxu1 %v688_v63 }
 0x10f   : > { %v629_v4 = vadd.f32 %v1446_v5, %v606_v0  ;;  %v1180_v6 = vadd.f32 %v1179_v1, %v1178_v62  ;;  %v676_v16 = vsel %vm644_vm6, %v628_v57, %v660_v3  ;;  %v1502_v1 = vpop.permute.xlu0 %591 }
 0x110   : > { %v1181_v8 = vpop.f32.mrf.mxu0 }
 0x111   : > { %v661_v10 = vmul.f32 0.01, %v629_v4  ;;  %v607_v11 = vmul.f32 %v1180_v6, %v1478_v7  ;;  %vm645_vm7 = vcmp.gt.f32.partialorder %v629_v4, 0.0 }
 0x112   : > { %v1182_v12 = vpop.f32.mrf.mxu0 }
 0x113   : > { %v630_v13 = vadd.f32 %v1446_v5, %v607_v11  ;;  %v1183_v15 = vadd.f32 %v1182_v12, %v1181_v8  ;;  %v677_v17 = vsel %vm645_vm7, %v629_v4, %v661_v10 }
 0x114   : > { %v1184_v19 = vpop.f32.mrf.mxu0  ;;  %v689_v20 = vpack.c.bf16 %v677_v17, %v676_v16 }
 0x115   : > { %v608_v21 = vmul.f32 %v1183_v15, %v1482_v18  ;;  %v662_v23 = vmul.f32 0.01, %v630_v13  ;;  %vm646_vm8 = vcmp.gt.f32.partialorder %v630_v13, 0.0  ;;  %v597_v15 = vpop.permute.xlu1 %596 }
 0x116   : > { %v1185_v22 = vpop.f32.mrf.mxu0  ;;  %1239 = vmatmul.mubr.bf16.gmra.mxu1 %v689_v20 }
 0x117   : > { %v631_v24 = vadd.f32 %v1446_v5, %v608_v21  ;;  %v1186_v25 = vadd.f32 %v1185_v22, %v1184_v19  ;;  %v678_v34 = vsel %vm646_vm8, %v630_v13, %v662_v23 }
 0x118   : > { %v1187_v28 = vpop.f32.mrf.mxu0 }
 0x119   : > { %v663_v29 = vmul.f32 0.01, %v631_v24  ;;  %v609_v30 = vmul.f32 %v1186_v25, %v1486_v26  ;;  %vm647_vm9 = vcmp.gt.f32.partialorder %v631_v24, 0.0 }
 0x11a   : > { %v1188_v31 = vpop.f32.mrf.mxu0 }
 0x11b   : > { %v632_v32 = vadd.f32 %v1446_v5, %v609_v30  ;;  %v1189_v33 = vadd.f32 %v1188_v31, %v1187_v28  ;;  %v679_v36 = vsel %vm647_vm9, %v631_v24, %v663_v29 }
 0x11c   : > { %v1190_v38 = vpop.f32.mrf.mxu0  ;;  %v690_v39 = vpack.c.bf16 %v679_v36, %v678_v34 }
 0x11d   : > { %v610_v40 = vmul.f32 %v1189_v33, %v1490_v37  ;;  %v664_v42 = vmul.f32 0.01, %v632_v32  ;;  %vm648_vm10 = vcmp.gt.f32.partialorder %v632_v32, 0.0 }
 0x11e   : > { %v1191_v41 = vpop.f32.mrf.mxu0  ;;  %1242 = vmatprep.mubr.bf16.mxu1 %v690_v39 }
 0x11f   : > { %v633_v43 = vadd.f32 %v1446_v5, %v610_v40  ;;  %v1192_v45 = vadd.f32 %v1191_v41, %v1190_v38  ;;  %v680_v54 = vsel %vm648_vm10, %v632_v32, %v664_v42 }
 0x120   : > { %v1193_v47 = vpop.f32.mrf.mxu0 }
 0x121   : > { %v665_v48 = vmul.f32 0.01, %v633_v43  ;;  %v611_v49 = vmul.f32 %v1192_v45, %v1494_v46  ;;  %vm649_vm11 = vcmp.gt.f32.partialorder %v633_v43, 0.0 }
 0x122   : > { %v1194_v50 = vpop.f32.mrf.mxu0 }
 0x123   : > { %v634_v51 = vadd.f32 %v1446_v5, %v611_v49  ;;  %v1195_v53 = vadd.f32 %v1194_v50, %v1193_v47  ;;  %v681_v55 = vsel %vm649_vm11, %v633_v43, %v665_v48 }
 0x124   : > { %v1196_v57 = vpop.f32.mrf.mxu0  ;;  %v691_v58 = vpack.c.bf16 %v681_v55, %v680_v54 }
 0x125   : > { %v612_v59 = vmul.f32 %v1195_v53, %v1498_v56  ;;  %v666_v62 = vmul.f32 0.01, %v634_v51  ;;  %vm650_vm12 = vcmp.gt.f32.partialorder %v634_v51, 0.0 }
 0x126   : > { %v1197_v60 = vpop.f32.mrf.mxu0  ;;  %1243 = vmatmul.mubr.bf16.gmra.mxu1 %v691_v58 }
 0x127   : > { %v635_v63 = vadd.f32 %v1446_v5, %v612_v59  ;;  %v1198_v0 = vadd.f32 %v1197_v60, %v1196_v57  ;;  %v682_v12 = vsel %vm650_vm12, %v634_v51, %v666_v62 }
 0x128   : > { %v1199_v3 = vpop.f32.mrf.mxu0 }
 0x129   : > { %v667_v4 = vmul.f32 0.01, %v635_v63  ;;  %v613_v6 = vmul.f32 %v1198_v0, %v1502_v1  ;;  %vm651_vm13 = vcmp.gt.f32.partialorder %v635_v63, 0.0 }
 0x12a   : > { %v1200_v8 = vpop.f32.mrf.mxu0 }
 0x12b   : > { %v636_v10 = vadd.f32 %v1446_v5, %v613_v6  ;;  %v1201_v11 = vadd.f32 %v1200_v8, %v1199_v3  ;;  %v683_v13 = vsel %vm651_vm13, %v635_v63, %v667_v4 }
 0x12c   : > { %v692_v16 = vpack.c.bf16 %v683_v13, %v682_v12 }
 0x12d   : > { %v614_v17 = vmul.f32 %v1201_v11, %v597_v15  ;;  %v668_v19 = vmul.f32 0.01, %v636_v10  ;;  %vm652_vm14 = vcmp.gt.f32.partialorder %v636_v10, 0.0 }
 0x12e   : > { %1246 = vmatprep.mubr.bf16.mxu1 %v692_v16 }
 0x12f   : > { %v637_v20 = vadd.f32 %v1446_v5, %v614_v17  ;;  %v684_v22 = vsel %vm652_vm14, %v636_v10, %v668_v19 }
 0x131   : > { %v669_v21 = vmul.f32 0.01, %v637_v20  ;;  %vm653_vm15 = vcmp.gt.f32.partialorder %v637_v20, 0.0 }
 0x133   : > { %v685_v23 = vsel %vm653_vm15, %v637_v20, %v669_v21 }
 0x134   : > { %v693_v24 = vpack.c.bf16 %v685_v23, %v684_v22 }
 0x136   : > { %1247 = vmatmul.mubr.bf16.gmra.mxu1 %v693_v24 }
 0x1c6   : > { %v1236_v25 = vpop.f32.mrf.mxu1 }
 0x1c7   : > { %v857_v30 = vmul.f32 %v1236_v25, %v1453_v14 }
 0x1c8   : > { %v792_v28 = vpop.f32.mrf.mxu1 }
 0x1c9   : > { %v855_v32 = vmul.f32 %v792_v28, %v1441_v2 }
 0x1ca   : > { %v1237_v29 = vpop.f32.mrf.mxu1 }
 0x1cb   : > { %v858_v31 = vmul.f32 %v1237_v29, %v1458_v27 }
 0x1cc   : > { %v795_v5 = vpop.f32.mrf.mxu1 }
 0x1cd   : > { %v1099_v33 = vpack.c.bf16 %v858_v31, %v857_v30  ;;  %v856_v34 = vmul.f32 %v795_v5, %v1449_v9 }
 0x1cf   : > { %1131 = vst [vmem:[%s1513_s12 + $0x8] sm:$0xff] %v1099_v33   ;;  %v1094_v36 = vpack.c.bf16 %v856_v34, %v855_v32 }
 0x1d1   : > { %1095 = vst [vmem:[%s1513_s12] sm:$0xff] %v1094_v36  }
 0x1d6   : > { %v1240_v14 = vpop.f32.mrf.mxu1 }
 0x1d7   : > { %v861_v39 = vmul.f32 %v1240_v14, %v1470_v52 }
 0x1d8   : > { %v808_v27 = vpop.f32.mrf.mxu1 }
 0x1d9   : > { %v859_v42 = vmul.f32 %v808_v27, %v1462_v35 }
 0x1da   : > { %v1241_v38 = vpop.f32.mrf.mxu1 }
 0x1db   : > { %v862_v40 = vmul.f32 %v1241_v38, %v1474_v61 }
 0x1dc   : > { %v811_v41 = vpop.f32.mrf.mxu1 }
 0x1dd   : > { %v1109_v43 = vpack.c.bf16 %v862_v40, %v861_v39  ;;  %v860_v2 = vmul.f32 %v811_v41, %v1466_v44 }
 0x1df   : > { %1133 = vst [vmem:[%s1513_s12 + $0x18] sm:$0xff] %v1109_v43   ;;  %v1104_v9 = vpack.c.bf16 %v860_v2, %v859_v42 }
 0x1e1   : > { %1132 = vst [vmem:[%s1513_s12 + $0x10] sm:$0xff] %v1104_v9  }
 0x1e6   : > { %v1244_v45 = vpop.f32.mrf.mxu1 }
 0x1e7   : > { %v865_v49 = vmul.f32 %v1244_v45, %v1486_v26 }
 0x1e8   : > { %v824_v47 = vpop.f32.mrf.mxu1 }
 0x1e9   : > { %v863_v61 = vmul.f32 %v824_v47, %v1478_v7 }
 0x1ea   : > { %v1245_v48 = vpop.f32.mrf.mxu1 }
 0x1eb   : > { %v866_v52 = vmul.f32 %v1245_v48, %v1490_v37 }
 0x1ec   : > { %v827_v50 = vpop.f32.mrf.mxu1 }
 0x1ed   : > { %v1119_v51 = vpack.c.bf16 %v866_v52, %v865_v49  ;;  %v864_v35 = vmul.f32 %v827_v50, %v1482_v18 }
 0x1ef   : > { %1135 = vst [vmem:[%s1513_s12 + $0x28] sm:$0xff] %v1119_v51   ;;  %v1114_v44 = vpack.c.bf16 %v864_v35, %v863_v61 }
 0x1f1   : > { %1134 = vst [vmem:[%s1513_s12 + $0x20] sm:$0xff] %v1114_v44  }
 0x1f6   : > { %v1248_v53 = vpop.f32.mrf.mxu1 }
 0x1f7   : > { %v869_v57 = vmul.f32 %v1248_v53, %v1502_v1 }
 0x1f8   : > { %v840_v54 = vpop.f32.mrf.mxu1 }
 0x1f9   : > { %v867_v37 = vmul.f32 %v840_v54, %v1494_v46 }
 0x1fa   : > { %v1249_v55 = vpop.f32.mrf.mxu1 }
 0x1fb   : > { %v870_v58 = vmul.f32 %v1249_v55, %v597_v15 }
 0x1fc   : > { %v843_v26 = vpop.f32.mrf.mxu1 }
 0x1fd   : > { %v1129_v59 = vpack.c.bf16 %v870_v58, %v869_v57  ;;  %v868_v60 = vmul.f32 %v843_v26, %v1498_v56 }
 0x1ff   : > { %1137 = vst [vmem:[%s1513_s12 + $0x38] sm:$0xff] %v1129_v59   ;;  %v1124_v7 = vpack.c.bf16 %v868_v60, %v867_v37 }
 0x201   : > { %1136 = vst [vmem:[%s1513_s12 + $0x30] sm:$0xff] %v1124_v7  }
 0x202 PF: > { %s15_s18 = sadd.s32 1, %s1291_s18  }
 0x203   : > { %p12_p5 = scmp.ge.s32.totalorder %s15_s18, 4  }
 0x205   :  { %14 = sbr.rel (!%p12_p5) target bundleno = 1 (0x1), region = 73 }

// kernel: mynet_forward.5
= control target key start
LH: loop header
LB: loop body
LE: loop exit
PB: predicated region body
PF: predicated region fallthrough
CT: control target
= control target key end

     0   :  { %s1111_s15 = smov 0   ;;  %s1428_s0 = inlined_call_operand.vmem [shape: s8[256,256], index: 0, kind: input, shape index: {}]   ;;  %s1429_s1 = inlined_call_operand.vmem [shape: bf16[256,128], index: 1, kind: input, shape index: {}]   ;;  %s1430_s2 = inlined_call_operand.vmem [shape: f32[256,1], index: 2, kind: input, shape index: {}]   ;;  %s1431_s3 = inlined_call_operand.vmem [shape: f32[1,128], index: 3, kind: input, shape index: {}]   ;;  %s1432_s4 = inlined_call_operand.vmem [shape: f32[256,128], index: 4, kind: output, shape index: {}]  }
   0x1 LB: > { %s874_s16 = sadd.s32 4294967295, %s1083_s15   ;;  %p878_p0 = scmp.ge.s32.totalorder %s1083_s15, 1  ;;  %s1083_s15 = sphi %s1111_s15, %s14_s15  }
   0x2   : > { %p175_p1 = scmp.lt.s32.totalorder %s1083_s15, 3 }
   0x4   : > { %p176_p2 = pnand %p878_p0, %p175_p1 }
   0x5   : > { %s879_s19 = sshll.u32 (!%p176_p2), %s874_s16, 2  ;;  %s882_s28 = sshll.u32 (!%p176_p2), %s874_s16, 4 }
   0x6   : > { %179 = sbr.rel (%p176_p2) target bundleno = 592 (0x250), region = 36  ;;  %p208_p3 = scmp.lt.s32.totalorder (!%p176_p2), %s879_s19, 7 }
   0x7   : > { %p215_p4 = scmp.lt.s32.totalorder (!%p176_p2), %s882_s28, 31 }
   0xb   : > { %v997_v0 = vld [vmem:[%s1429_s1 + $0x78] sm:$0xff]   ;;  %v999_v2 = vld [vmem:[%s1429_s1 + $0x70] sm:$0xff]   ;;  %v1001_v4 = vld [vmem:[%s1429_s1 + $0x68] sm:$0xff]   ;;  %s1434_s19 = smov (!%p208_p3, %s879_s19), 7  ;;  %v1085_v5 = vmov 0   ;;  %s1436_s28 = smov (!%p215_p4, %s882_s28), 31 }
   0xc   : > { %v998_v1 = vld [vmem:[%s1429_s1 + $0x38] sm:$0xff]   ;;  %906 = vmatprep.subr.bf16.mxu0 %v997_v0  ;;  %970 = vmatprep.subr.bf16.mxu1 %v997_v0  ;;  %v1000_v3 = vld [vmem:[%s1429_s1 + $0x30] sm:$0xff]   ;;  %v1002_v6 = vld [vmem:[%s1429_s1 + $0x28] sm:$0xff]   ;;  %s905_s7 = sshll.u32 %s1434_s19, 4  ;;  %s883_s16 = sshll.u32 %s1436_s28, 3  ;;  %v611_v0 = vlaneseq }
   0xd   : > { %907 = vmatpush3.bf16.msra.mxu0 %v998_v1  ;;  %978 = vmatpush3.bf16.msra.mxu1 %v998_v1  ;;  %v1003_v7 = vld [vmem:[%s1429_s1 + $0x60] sm:$0xff]   ;;  %v1005_v9 = vld [vmem:[%s1429_s1 + $0x58] sm:$0xff]   ;;  %s1151_s14 = scalar_lea.vmem %s1428_s0, %s905_s7  ;;  %v1007_v11 = vld [vmem:[%s1429_s1 + $0x50] sm:$0xff]   ;;  %s1167_s23 = scalar_lea.vmem %s1430_s2, %s883_s16 }
   0xe   : > { %908 = vmatprep.subr.bf16.mxu0 %v999_v2  ;;  %971 = vmatprep.subr.bf16.mxu1 %v999_v2  ;;  %v1004_v8 = vld [vmem:[%s1429_s1 + $0x20] sm:$0xff]   ;;  %v1006_v10 = vld [vmem:[%s1429_s1 + $0x18] sm:$0xff]   ;;  %v228_v12 = vld [vmem:[%s1151_s14 + $0x8] sm:$0xff]  ;;  %s1391_s13 = scalar_lea.vmem %s1432_s4, %s883_s16 }
   0xf   : > { %995 = vset.pattern.permute.xlu0 %v1085_v5  ;;  %996 = vset.pattern.permute.xlu1 %v1085_v5  ;;  %v232_v13 = vld [vmem:[%s1151_s14 + $0x28] sm:$0xff]  ;;  %v236_v14 = vunpack.c.l.s8.bf16 %v228_v12  ;;  %v1008_v16 = vld [vmem:[%s1429_s1 + $0x10] sm:$0xff]   ;;  %v476_v17 = vld [vmem:[%s1167_s23] sm:$0xff]  ;;  %v238_v31 = vunpack.c.h.s8.bf16 %v228_v12 }
  0x10   : > { %v244_v15 = vunpack.c.l.s8.bf16 %v232_v13  ;;  %v478_v18 = vld [vmem:[%s1167_s23 + $0x10] sm:$0xff]  ;;  %v1009_v19 = vld [vmem:[%s1429_s1 + $0x48] sm:$0xff]   ;;  %494 = vperm.xlu0 %995, %v476_v17   ;;  %v479_v22 = vld [vmem:[%s1167_s23 + $0x18] sm:$0xff]  ;;  %v246_v32 = vunpack.c.h.s8.bf16 %v232_v13 }
  0x11   : > { %909 = vmatpush3.bf16.msra.mxu0 %v1000_v3  ;;  %979 = vmatpush3.bf16.msra.mxu1 %v1000_v3  ;;  %v1010_v20 = vld [vmem:[%s1429_s1 + $0x8] sm:$0xff]   ;;  %v1011_v23 = vld [vmem:[%s1429_s1 + $0x40] sm:$0xff]   ;;  %v482_v33 = vld [vmem:[%s1167_s23 + $0x30] sm:$0xff] }
  0x12   : > { %910 = vmatprep.subr.bf16.mxu0 %v1001_v4  ;;  %972 = vmatprep.subr.bf16.mxu1 %v1001_v4  ;;  %v477_v21 = vld [vmem:[%s1167_s23 + $0x8] sm:$0xff]  ;;  %v1012_v24 = vld [vmem:[%s1429_s1] sm:$0xff]   ;;  %v483_v34 = vld [vmem:[%s1167_s23 + $0x38] sm:$0xff] }
  0x13   : > { %411 = vmatprep.mubr.bf16.mxu0 %v236_v14  ;;  %443 = vmatprep.mubr.bf16.mxu1 %v244_v15  ;;  %v227_v25 = vld [vmem:[%s1151_s14] sm:$0xff]  ;;  %v481_v28 = vld [vmem:[%s1167_s23 + $0x28] sm:$0xff]  ;;  %v230_v35 = vld [vmem:[%s1151_s14 + $0x18] sm:$0xff] }
  0x14   : > { %504 = vperm.xlu1 %996, %v478_v18   ;;  %499 = vperm.xlu0 %995, %v477_v21   ;;  %v231_v26 = vld [vmem:[%s1151_s14 + $0x20] sm:$0xff]  ;;  %v235_v29 = vunpack.c.l.s8.bf16 %v227_v25  ;;  %v234_v36 = vld [vmem:[%s1151_s14 + $0x38] sm:$0xff]  ;;  %v485_v38 = vld [vmem:[%s1167_s23 + $0x48] sm:$0xff]  ;;  %v237_v39 = vunpack.c.h.s8.bf16 %v227_v25  ;;  %v240_v41 = vunpack.c.l.s8.bf16 %v230_v35  ;;  %v242_v51 = vunpack.c.h.s8.bf16 %v230_v35 }
  0x15   : > { %911 = vmatpush3.bf16.msra.mxu0 %v1002_v6  ;;  %980 = vmatpush3.bf16.msra.mxu1 %v1002_v6  ;;  %v480_v27 = vld [vmem:[%s1167_s23 + $0x20] sm:$0xff]  ;;  %v243_v30 = vunpack.c.l.s8.bf16 %v231_v26  ;;  %v245_v40 = vunpack.c.h.s8.bf16 %v231_v26  ;;  %v248_v42 = vunpack.c.l.s8.bf16 %v234_v36  ;;  %v486_v43 = vld [vmem:[%s1167_s23 + $0x50] sm:$0xff]  ;;  %v487_v44 = vld [vmem:[%s1167_s23 + $0x58] sm:$0xff]  ;;  %v250_v52 = vunpack.c.h.s8.bf16 %v234_v36 }
  0x16   : > { %912 = vmatprep.subr.bf16.mxu0 %v1003_v7  ;;  %973 = vmatprep.subr.bf16.mxu1 %v1003_v7  ;;  %v484_v37 = vld [vmem:[%s1167_s23 + $0x40] sm:$0xff]  ;;  %v229_v45 = vld [vmem:[%s1151_s14 + $0x10] sm:$0xff]  ;;  %v489_v48 = vld [vmem:[%s1167_s23 + $0x68] sm:$0xff]  ;;  %v1214_v6 = vand.u32 127, %v611_v0 }
  0x17   : > { %v233_v46 = vld [vmem:[%s1151_s14 + $0x30] sm:$0xff]  ;;  %v488_v47 = vld [vmem:[%s1167_s23 + $0x60] sm:$0xff]  ;;  %v239_v49 = vunpack.c.l.s8.bf16 %v229_v45  ;;  %v491_v54 = vld [vmem:[%s1167_s23 + $0x78] sm:$0xff]  ;;  %v241_v55 = vunpack.c.h.s8.bf16 %v229_v45 }
  0x18   : > { %509 = vperm.xlu1 %996, %v479_v22   ;;  %514 = vperm.xlu0 %995, %v480_v27   ;;  %v247_v50 = vunpack.c.l.s8.bf16 %v233_v46  ;;  %v490_v53 = vld [vmem:[%s1167_s23 + $0x70] sm:$0xff]  ;;  %v249_v56 = vunpack.c.h.s8.bf16 %v233_v46  ;;  %v1219_v12 = vld [vmem:[%s1431_s3] ss:$0 sm:$0xff]  ;;  %vm613_vm0 = vcmp.lt.s32.totalorder %v1214_v6, 8 }
  0x19   : > { %913 = vmatpush3.bf16.msra.mxu0 %v1004_v8  ;;  %981 = vmatpush3.bf16.msra.mxu1 %v1004_v8 }
  0x1a   : > { %914 = vmatprep.subr.bf16.mxu0 %v1005_v9  ;;  %974 = vmatprep.subr.bf16.mxu1 %v1005_v9 }
  0x1c   : > { %519 = vperm.xlu1 %996, %v481_v28   ;;  %524 = vperm.xlu0 %995, %v482_v33  }
  0x1d   : > { %915 = vmatpush3.bf16.msra.mxu0 %v1006_v10  ;;  %982 = vmatpush3.bf16.msra.mxu1 %v1006_v10 }
  0x1e   : > { %916 = vmatprep.subr.bf16.mxu0 %v1007_v11  ;;  %975 = vmatprep.subr.bf16.mxu1 %v1007_v11 }
  0x20   : > { %529 = vperm.xlu1 %996, %v483_v34   ;;  %534 = vperm.xlu0 %995, %v484_v37  }
  0x21   : > { %917 = vmatpush3.bf16.msra.mxu0 %v1008_v16  ;;  %983 = vmatpush3.bf16.msra.mxu1 %v1008_v16 }
  0x22   : > { %918 = vmatprep.subr.bf16.mxu0 %v1009_v19  ;;  %976 = vmatprep.subr.bf16.mxu1 %v1009_v19 }
  0x24   : > { %539 = vperm.xlu1 %996, %v485_v38   ;;  %544 = vperm.xlu0 %995, %v486_v43  }
  0x25   : > { %919 = vmatpush3.bf16.msra.mxu0 %v1010_v20  ;;  %984 = vmatpush3.bf16.msra.mxu1 %v1010_v20 }
  0x26   : > { %920 = vmatprep.subr.bf16.mxu0 %v1011_v23  ;;  %977 = vmatprep.subr.bf16.mxu1 %v1011_v23 }
  0x28   : > { %549 = vperm.xlu1 %996, %v487_v44   ;;  %554 = vperm.xlu0 %995, %v488_v47  }
  0x29   : > { %921 = vmatpush3.bf16.msra.mxu0 %v1012_v24  ;;  %985 = vmatpush3.bf16.msra.mxu1 %v1012_v24 }
  0x2c   : > { %412 = vmatmul.mubr.bf16.vlgmr.msra.gmra.mxu0 %v235_v29  ;;  %444 = vmatmul.mubr.bf16.vlgmr.msra.gmra.mxu1 %v243_v30 }
  0x2d   : > { %419 = vmatprep.mubr.bf16.mxu0 %v238_v31  ;;  %451 = vmatprep.mubr.bf16.mxu1 %v246_v32 }
  0x2e   : > { %559 = vperm.xlu1 %996, %v489_v48   ;;  %564 = vperm.xlu0 %995, %v490_v53  }
  0x32   : > { %569 = vperm.xlu1 %996, %v491_v54  }
  0x34   : > { %420 = vmatmul.mubr.bf16.gmra.mxu0 %v237_v39  ;;  %452 = vmatmul.mubr.bf16.gmra.mxu1 %v245_v40 }
  0x35   : > { %427 = vmatprep.mubr.bf16.mxu0 %v240_v41  ;;  %459 = vmatprep.mubr.bf16.mxu1 %v248_v42 }
  0x3c   : > { %428 = vmatmul.mubr.bf16.gmra.mxu0 %v239_v49  ;;  %460 = vmatmul.mubr.bf16.gmra.mxu1 %v247_v50 }
  0x3d   : > { %435 = vmatprep.mubr.bf16.mxu0 %v242_v51  ;;  %467 = vmatprep.mubr.bf16.mxu1 %v250_v52 }
  0x44   : > { %436 = vmatmul.mubr.bf16.gmra.mxu0 %v241_v55  ;;  %468 = vmatmul.mubr.bf16.gmra.mxu1 %v249_v56 }
  0x8b   : > { %v495_v57 = vpop.permute.xlu0 %494 }
  0x8f   : > { %v505_v58 = vpop.permute.xlu1 %504  ;;  %v500_v59 = vpop.permute.xlu0 %499 }
  0x93   : > { %v510_v60 = vpop.permute.xlu1 %509  ;;  %v1206_v61 = vpop.permute.xlu0 %514 }
  0x97   : > { %v1208_v62 = vpop.permute.xlu1 %519  ;;  %v1210_v63 = vpop.permute.xlu0 %524 }
  0x9b   : > { %v1212_v3 = vpop.permute.xlu1 %529  ;;  %v535_v7 = vpop.permute.xlu0 %534 }
  0x9f   : > { %v540_v17 = vpop.permute.xlu1 %539  ;;  %v545_v30 = vpop.permute.xlu0 %544 }
  0xa3   : > { %v550_v43 = vpop.permute.xlu1 %549  ;;  %v555_v56 = vpop.permute.xlu0 %554 }
  0xec   : > { %v922_v1 = vpop.f32.mrf.mxu0  ;;  %v946_v2 = vpop.f32.mrf.mxu1 }
  0xee   : > { %v923_v4 = vpop.f32.mrf.mxu0  ;;  %v947_v5 = vpop.f32.mrf.mxu1 }
  0xef   : > { %v924_v8 = vadd.f32 %v923_v4, %v922_v1  ;;  %v948_v9 = vadd.f32 %v947_v5, %v946_v2 }
  0xf0   : > { %v925_v10 = vpop.f32.mrf.mxu0  ;;  %v949_v11 = vpop.f32.mrf.mxu1 }
  0xf1   : > { %v572_v13 = vmul.f32 %v924_v8, %v495_v57  ;;  %v580_v14 = vmul.f32 %v948_v9, %v535_v7  ;;  %v560_v9 = vpop.permute.xlu1 %559 }
  0xf2   : > { %v926_v15 = vpop.f32.mrf.mxu0  ;;  %v950_v16 = vpop.f32.mrf.mxu1 }
  0xf3   : > { %v927_v18 = vadd.f32 %v926_v15, %v925_v10  ;;  %v951_v19 = vadd.f32 %v950_v16, %v949_v11  ;;  %v603_v20 = vadd.f32 %v1219_v12, %v580_v14  ;;  %v595_v21 = vadd.f32 %v1219_v12, %v572_v13 }
  0xf4   : > { %v928_v22 = vpop.f32.mrf.mxu0  ;;  %v952_v23 = vpop.f32.mrf.mxu1 }
  0xf5   : > { %v573_v24 = vmul.f32 %v927_v18, %v500_v59  ;;  %v581_v25 = vmul.f32 %v951_v19, %v540_v17  ;;  %v1226_v26 = vsel %vm613_vm0, %v603_v20, -1e+30  ;;  %v1230_v27 = vsel %vm613_vm0, %v595_v21, -1e+30 }
  0xf6   : > { %v953_v28 = vpop.f32.mrf.mxu1  ;;  %646 = vmax.xlane.f32.xlu1 %v1226_v26  ;;  %v929_v29 = vpop.f32.mrf.mxu0  ;;  %630 = vmax.xlane.f32.xlu0 %v1230_v27 }
  0xf7   : > { %v954_v31 = vadd.f32 %v953_v28, %v952_v23  ;;  %v930_v32 = vadd.f32 %v929_v29, %v928_v22  ;;  %v596_v33 = vadd.f32 %v1219_v12, %v573_v24  ;;  %v604_v34 = vadd.f32 %v1219_v12, %v581_v25  ;;  %v565_v22 = vpop.permute.xlu0 %564 }
  0xf8   : > { %v931_v35 = vpop.f32.mrf.mxu0  ;;  %v955_v36 = vpop.f32.mrf.mxu1 }
  0xf9   : > { %v582_v37 = vmul.f32 %v954_v31, %v545_v30  ;;  %v574_v38 = vmul.f32 %v930_v32, %v505_v58  ;;  %v1238_v39 = vsel %vm613_vm0, %v596_v33, -1e+30  ;;  %v1242_v40 = vsel %vm613_vm0, %v604_v34, -1e+30 }
  0xfa   : > { %v932_v41 = vpop.f32.mrf.mxu0  ;;  %v956_v42 = vpop.f32.mrf.mxu1  ;;  %632 = vmax.xlane.f32.xlu1 %v1238_v39  ;;  %648 = vmax.xlane.f32.xlu0 %v1242_v40 }
  0xfb   : > { %v933_v44 = vadd.f32 %v932_v41, %v931_v35  ;;  %v957_v45 = vadd.f32 %v956_v42, %v955_v36  ;;  %v605_v46 = vadd.f32 %v1219_v12, %v582_v37  ;;  %v597_v47 = vadd.f32 %v1219_v12, %v574_v38 }
  0xfc   : > { %v934_v48 = vpop.f32.mrf.mxu0  ;;  %v958_v49 = vpop.f32.mrf.mxu1 }
  0xfd   : > { %v575_v50 = vmul.f32 %v933_v44, %v510_v60  ;;  %v583_v51 = vmul.f32 %v957_v45, %v550_v43  ;;  %v1250_v52 = vsel %vm613_vm0, %v605_v46, -1e+30  ;;  %v1254_v53 = vsel %vm613_vm0, %v597_v47, -1e+30 }
  0xfe   : > { %v935_v54 = vpop.f32.mrf.mxu0  ;;  %v959_v55 = vpop.f32.mrf.mxu1  ;;  %650 = vmax.xlane.f32.xlu1 %v1250_v52  ;;  %634 = vmax.xlane.f32.xlu0 %v1254_v53 }
  0xff   : > { %v936_v57 = vadd.f32 %v935_v54, %v934_v48  ;;  %v960_v58 = vadd.f32 %v959_v55, %v958_v49  ;;  %v598_v59 = vadd.f32 %v1219_v12, %v575_v50  ;;  %v606_v1 = vadd.f32 %v1219_v12, %v583_v51 }
 0x100   : > { %v937_v60 = vpop.f32.mrf.mxu0  ;;  %v961_v0 = vpop.f32.mrf.mxu1 }
 0x101   : > { %v576_v2 = vmul.f32 %v936_v57, %v1206_v61  ;;  %v584_v4 = vmul.f32 %v960_v58, %v555_v56  ;;  %v1263_v5 = vsel %vm613_vm0, %v598_v59, -1e+30  ;;  %v1269_v16 = vsel %vm613_vm0, %v606_v1, -1e+30 }
 0x102   : > { %v938_v7 = vpop.f32.mrf.mxu0  ;;  %v962_v8 = vpop.f32.mrf.mxu1  ;;  %636 = vmax.xlane.f32.xlu0 %v1263_v5 }
 0x103   : > { %v939_v10 = vadd.f32 %v938_v7, %v937_v60  ;;  %v963_v11 = vadd.f32 %v962_v8, %v961_v0  ;;  %v599_v13 = vadd.f32 %v1219_v12, %v576_v2  ;;  %v607_v19 = vadd.f32 %v1219_v12, %v584_v4 }
 0x104   : > { %v940_v14 = vpop.f32.mrf.mxu0  ;;  %v964_v15 = vpop.f32.mrf.mxu1 }
 0x105   : > { %v577_v61 = vmul.f32 %v939_v10, %v1208_v62  ;;  %v585_v17 = vmul.f32 %v963_v11, %v560_v9  ;;  %v1274_v18 = vsel %vm613_vm0, %v599_v13, -1e+30  ;;  %v1284_v32 = vsel %vm613_vm0, %v607_v19, -1e+30 }
 0x106   : > { %v941_v20 = vpop.f32.mrf.mxu0  ;;  %v965_v21 = vpop.f32.mrf.mxu1  ;;  %638 = vmax.xlane.f32.xlu1 %v1274_v18  ;;  %652 = vmax.xlane.f32.xlu0 %v1269_v16 }
 0x107   : > { %v942_v23 = vadd.f32 %v941_v20, %v940_v14  ;;  %v966_v24 = vadd.f32 %v965_v21, %v964_v15  ;;  %v600_v25 = vadd.f32 %v1219_v12, %v577_v61  ;;  %v608_v29 = vadd.f32 %v1219_v12, %v585_v17 }
 0x108   : > { %v943_v28 = vpop.f32.mrf.mxu0  ;;  %v967_v62 = vpop.f32.mrf.mxu1 }
 0x109   : > { %v578_v30 = vmul.f32 %v942_v23, %v1210_v63  ;;  %v586_v31 = vmul.f32 %v966_v24, %v565_v22  ;;  %v1288_v33 = vsel %vm613_vm0, %v600_v25, -1e+30  ;;  %v570_v63 = vpop.permute.xlu1 %569  ;;  %v1295_v41 = vsel %vm613_vm0, %v608_v29, -1e+30 }
 0x10a   : > { %v944_v34 = vpop.f32.mrf.mxu0  ;;  %v968_v35 = vpop.f32.mrf.mxu1  ;;  %654 = vmax.xlane.f32.xlu1 %v1284_v32  ;;  %640 = vmax.xlane.f32.xlu0 %v1288_v33 }
 0x10b   : > { %v945_v36 = vadd.f32 %v944_v34, %v943_v28  ;;  %v969_v37 = vadd.f32 %v968_v35, %v967_v62  ;;  %v601_v38 = vadd.f32 %v1219_v12, %v578_v30  ;;  %v609_v45 = vadd.f32 %v1219_v12, %v586_v31 }
 0x10d   : > { %v579_v42 = vmul.f32 %v945_v36, %v1212_v3  ;;  %v587_v43 = vmul.f32 %v969_v37, %v570_v63  ;;  %v1300_v44 = vsel %vm613_vm0, %v601_v38, -1e+30  ;;  %v1308_v47 = vsel %vm613_vm0, %v609_v45, -1e+30 }
 0x10e   : > { %642 = vmax.xlane.f32.xlu1 %v1300_v44  ;;  %656 = vmax.xlane.f32.xlu0 %v1295_v41 }
 0x10f   : > { %v602_v46 = vadd.f32 %v1219_v12, %v579_v42  ;;  %v610_v48 = vadd.f32 %v1219_v12, %v587_v43 }
 0x111   : > { %v1312_v3 = vsel %vm613_vm0, %v602_v46, -1e+30  ;;  %v1319_v49 = vsel %vm613_vm0, %v610_v48, -1e+30 }
 0x112   : > { %658 = vmax.xlane.f32.xlu1 %v1308_v47  ;;  %644 = vmax.xlane.f32.xlu0 %v1312_v3 }
 0x116   : > { %660 = vmax.xlane.f32.xlu0 %v1319_v49 }
 0x17f   : > { %v647_v50 = vpop.xlane.xlu1 %646  ;;  %v631_v51 = vpop.xlane.xlu0 %630 }
 0x180   : > { %v1323_v54 = vsub.f32 %v1230_v27, %v631_v51  ;;  %v1326_v55 = vsub.f32 %v1226_v26, %v647_v50 }
 0x182   : > { %v678_v12 = vmul.f32 1.442695, %v1323_v54  ;;  %v694_v59 = vmul.f32 1.442695, %v1326_v55 }
 0x183   : > { %v633_v56 = vpop.xlane.xlu1 %632  ;;  %v649_v57 = vpop.xlane.xlu0 %648 }
 0x184   : > { %v1330_v58 = vsub.f32 %v1238_v39, %v633_v56  ;;  %v1333_v6 = vsub.f32 %v1242_v40, %v649_v57  ;;  %1013 = vpow2.f32 %v678_v12 }
 0x186   : > { %v680_v60 = vmul.f32 1.442695, %v1330_v58  ;;  %v696_v26 = vmul.f32 1.442695, %v1333_v6 }
 0x187   : > { %v651_v27 = vpop.xlane.xlu1 %650  ;;  %v635_v0 = vpop.xlane.xlu0 %634 }
 0x188   : > { %1015 = vpow2.f32 %v680_v60  ;;  %v1339_v1 = vsub.f32 %v1254_v53, %v635_v0  ;;  %v1342_v39 = vsub.f32 %v1250_v52, %v651_v27 }
 0x189   : > { %1017 = vpow2.f32 %v694_v59 }
 0x18a   : > { %v682_v40 = vmul.f32 1.442695, %v1339_v1  ;;  %1019 = vpow2.f32 %v696_v26  ;;  %v698_v7 = vmul.f32 1.442695, %v1342_v39 }
 0x18b   : > { %v637_v2 = vpop.xlane.xlu0 %636 }
 0x18c   : > { %v1346_v4 = vsub.f32 %v1263_v5, %v637_v2  ;;  %1021 = vpow2.f32 %v682_v40 }
 0x18e   : > { %v684_v8 = vmul.f32 1.442695, %v1346_v4 }
 0x18f   : > { %v639_v9 = vpop.xlane.xlu1 %638  ;;  %v653_v10 = vpop.xlane.xlu0 %652 }
 0x190   : > { %1023 = vpow2.f32 %v684_v8  ;;  %v1351_v53 = vsub.f32 %v1274_v18, %v639_v9  ;;  %v1354_v52 = vsub.f32 %v1269_v16, %v653_v10 }
 0x191   : > { %1025 = vpow2.f32 %v698_v7  ;;  %v1014_v11 = vpop.eup %1013 }
 0x192   : > { %v686_v13 = vmul.f32 1.442695, %v1351_v53  ;;  %v700_v5 = vmul.f32 1.442695, %v1354_v52  ;;  %710 = vadd.xlane.f32.xlu1 %v1014_v11 }
 0x193   : > { %v655_v14 = vpop.xlane.xlu1 %654  ;;  %v641_v15 = vpop.xlane.xlu0 %640 }
 0x194   : > { %1027 = vpow2.f32 %v686_v13  ;;  %v1359_v61 = vsub.f32 %v1284_v32, %v655_v14  ;;  %v1362_v17 = vsub.f32 %v1288_v33, %v641_v15 }
 0x195   : > { %v1016_v18 = vpop.eup %1015  ;;  %1029 = vpow2.f32 %v700_v5 }
 0x196   : > { %v1018_v16 = vpop.eup %1017  ;;  %v702_v19 = vmul.f32 1.442695, %v1359_v61  ;;  %v688_v20 = vmul.f32 1.442695, %v1362_v17  ;;  %712 = vadd.xlane.f32.xlu0 %v1016_v18 }
 0x197   : > { %726 = vadd.xlane.f32.xlu1 %v1018_v16  ;;  %v643_v21 = vpop.xlane.xlu1 %642  ;;  %v657_v22 = vpop.xlane.xlu0 %656 }
 0x198   : > { %1031 = vpow2.f32 %v702_v19  ;;  %v1367_v23 = vsub.f32 %v1300_v44, %v643_v21  ;;  %v1370_v24 = vsub.f32 %v1295_v41, %v657_v22  ;;  %v1020_v25 = vpop.eup %1019 }
 0x199   : > { %1033 = vpow2.f32 %v688_v20  ;;  %v1022_v28 = vpop.eup %1021 }
 0x19a   : > { %v690_v62 = vmul.f32 1.442695, %v1367_v23  ;;  %v704_v29 = vmul.f32 1.442695, %v1370_v24  ;;  %728 = vadd.xlane.f32.xlu0 %v1020_v25 }
 0x19b   : > { %714 = vadd.xlane.f32.xlu1 %v1022_v28  ;;  %v659_v30 = vpop.xlane.xlu1 %658  ;;  %v645_v31 = vpop.xlane.xlu0 %644 }
 0x19c   : > { %1035 = vpow2.f32 %v690_v62  ;;  %v1375_v32 = vsub.f32 %v1308_v47, %v659_v30  ;;  %v1378_v33 = vsub.f32 %v1312_v3, %v645_v31 }
 0x19d   : > { %v1024_v34 = vpop.eup %1023  ;;  %1037 = vpow2.f32 %v704_v29 }
 0x19e   : > { %v1026_v35 = vpop.eup %1025  ;;  %v706_v36 = vmul.f32 1.442695, %v1375_v32  ;;  %v692_v37 = vmul.f32 1.442695, %v1378_v33  ;;  %716 = vadd.xlane.f32.xlu0 %v1024_v34 }
 0x19f   : > { %730 = vadd.xlane.f32.xlu1 %v1026_v35  ;;  %v661_v38 = vpop.xlane.xlu0 %660 }
 0x1a0   : > { %1039 = vpow2.f32 %v706_v36  ;;  %v1383_v63 = vsub.f32 %v1319_v49, %v661_v38 }
 0x1a1   : > { %v1028_v41 = vpop.eup %1027  ;;  %1041 = vpow2.f32 %v692_v37 }
 0x1a2   : > { %v1030_v42 = vpop.eup %1029  ;;  %v708_v43 = vmul.f32 1.442695, %v1383_v63 }
 0x1a3   : > { %718 = vadd.xlane.f32.xlu1 %v1028_v41  ;;  %732 = vadd.xlane.f32.xlu0 %v1030_v42 }
 0x1a4   : > { %1043 = vpow2.f32 %v708_v43 }
 0x1a5   : > { %v1032_v44 = vpop.eup %1031 }
 0x1a6   : > { %v1034_v45 = vpop.eup %1033 }
 0x1a7   : > { %734 = vadd.xlane.f32.xlu1 %v1032_v44  ;;  %720 = vadd.xlane.f32.xlu0 %v1034_v45 }
 0x1a9   : > { %v1036_v46 = vpop.eup %1035 }
 0x1aa   : > { %v1038_v47 = vpop.eup %1037 }
 0x1ab   : > { %722 = vadd.xlane.f32.xlu1 %v1036_v46  ;;  %736 = vadd.xlane.f32.xlu0 %v1038_v47 }
 0x1ad   : > { %v1040_v3 = vpop.eup %1039 }
 0x1ae   : > { %v1042_v48 = vpop.eup %1041 }
 0x1af   : > { %738 = vadd.xlane.f32.xlu1 %v1040_v3  ;;  %724 = vadd.xlane.f32.xlu0 %v1042_v48 }
 0x1b1   : > { %v1044_v49 = vpop.eup %1043 }
 0x1b3   : > { %740 = vadd.xlane.f32.xlu0 %v1044_v49 }
 0x21b   : > { %v711_v50 = vpop.xlane.xlu1 %710 }
 0x21c   : > { %1045 = vlog2.f32 %v711_v50 }
 0x21f   : > { %v713_v51 = vpop.xlane.xlu0 %712 }
 0x220   : > { %v727_v12 = vpop.xlane.xlu1 %726  ;;  %1047 = vlog2.f32 %v713_v51 }
 0x221   : > { %1049 = vlog2.f32 %v727_v12 }
 0x223   : > { %v729_v56 = vpop.xlane.xlu0 %728 }
 0x224   : > { %v715_v57 = vpop.xlane.xlu1 %714  ;;  %1051 = vlog2.f32 %v729_v56 }
 0x225   : > { %1053 = vlog2.f32 %v715_v57 }
 0x227   : > { %v717_v59 = vpop.xlane.xlu0 %716 }
 0x228   : > { %v731_v60 = vpop.xlane.xlu1 %730  ;;  %1055 = vlog2.f32 %v717_v59 }
 0x229   : > { %1057 = vlog2.f32 %v731_v60  ;;  %v1046_v27 = vpop.eup %1045 }
 0x22a   : > { %v743_v0 = vmul.f32 0.6931472, %v1046_v27 }
 0x22c   : > { %v719_v26 = vpop.xlane.xlu1 %718  ;;  %v733_v40 = vpop.xlane.xlu0 %732  ;;  %v774_v7 = vsub.f32 %v1323_v54, %v743_v0 }
 0x22d   : > { %v1048_v2 = vpop.eup %1047  ;;  %1059 = vlog2.f32 %v719_v26 }
 0x22e   : > { %v1050_v8 = vpop.eup %1049  ;;  %v745_v9 = vmul.f32 0.6931472, %v1048_v2  ;;  %1061 = vlog2.f32 %v733_v40  ;;  %790 = vst [vmem:[%s1391_s13] sm:$0xff] %v774_v7 }
 0x22f   : > { %v759_v10 = vmul.f32 0.6931472, %v1050_v8 }
 0x230   : > { %v775_v11 = vsub.f32 %v1330_v58, %v745_v9  ;;  %v735_v13 = vpop.xlane.xlu1 %734  ;;  %v721_v5 = vpop.xlane.xlu0 %720 }
 0x231   : > { %v1052_v14 = vpop.eup %1051  ;;  %v782_v15 = vsub.f32 %v1326_v55, %v759_v10  ;;  %1063 = vlog2.f32 %v735_v13 }
 0x232   : > { %v1054_v18 = vpop.eup %1053  ;;  %791 = vst [vmem:[%s1391_s13 + $0x8] sm:$0xff] %v775_v11  ;;  %v761_v54 = vmul.f32 0.6931472, %v1052_v14  ;;  %1065 = vlog2.f32 %v721_v5 }
 0x233   : > { %798 = vst [vmem:[%s1391_s13 + $0x40] sm:$0xff] %v782_v15  ;;  %v747_v16 = vmul.f32 0.6931472, %v1054_v18 }
 0x234   : > { %v783_v19 = vsub.f32 %v1333_v6, %v761_v54  ;;  %v723_v20 = vpop.xlane.xlu1 %722  ;;  %v737_v21 = vpop.xlane.xlu0 %736 }
 0x235   : > { %v1056_v58 = vpop.eup %1055  ;;  %v776_v22 = vsub.f32 %v1339_v1, %v747_v16  ;;  %1067 = vlog2.f32 %v723_v20 }
 0x236   : > { %v1058_v25 = vpop.eup %1057  ;;  %799 = vst [vmem:[%s1391_s13 + $0x48] sm:$0xff] %v783_v19  ;;  %v749_v55 = vmul.f32 0.6931472, %v1056_v58  ;;  %1069 = vlog2.f32 %v737_v21 }
 0x237   : > { %792 = vst [vmem:[%s1391_s13 + $0x10] sm:$0xff] %v776_v22  ;;  %v763_v28 = vmul.f32 0.6931472, %v1058_v25 }
 0x238   : > { %v777_v62 = vsub.f32 %v1346_v4, %v749_v55  ;;  %v739_v29 = vpop.xlane.xlu1 %738  ;;  %v725_v30 = vpop.xlane.xlu0 %724 }
 0x239   : > { %v784_v6 = vsub.f32 %v1342_v39, %v763_v28  ;;  %1071 = vlog2.f32 %v739_v29 }
 0x23a   : > { %v1060_v31 = vpop.eup %1059  ;;  %793 = vst [vmem:[%s1391_s13 + $0x18] sm:$0xff] %v777_v62  ;;  %1073 = vlog2.f32 %v725_v30 }
 0x23b   : > { %v1062_v1 = vpop.eup %1061  ;;  %800 = vst [vmem:[%s1391_s13 + $0x50] sm:$0xff] %v784_v6  ;;  %v751_v34 = vmul.f32 0.6931472, %v1060_v31 }
 0x23c   : > { %v765_v35 = vmul.f32 0.6931472, %v1062_v1  ;;  %v741_v36 = vpop.xlane.xlu0 %740 }
 0x23d   : > { %v778_v37 = vsub.f32 %v1351_v53, %v751_v34  ;;  %1075 = vlog2.f32 %v741_v36 }
 0x23e   : > { %v1064_v4 = vpop.eup %1063  ;;  %v785_v38 = vsub.f32 %v1354_v52, %v765_v35 }
 0x23f   : > { %v1066_v41 = vpop.eup %1065  ;;  %794 = vst [vmem:[%s1391_s13 + $0x20] sm:$0xff] %v778_v37  ;;  %v767_v39 = vmul.f32 0.6931472, %v1064_v4 }
 0x240   : > { %801 = vst [vmem:[%s1391_s13 + $0x58] sm:$0xff] %v785_v38  ;;  %v753_v42 = vmul.f32 0.6931472, %v1066_v41 }
 0x241   : > { %v786_v43 = vsub.f32 %v1359_v61, %v767_v39 }
 0x242   : > { %v1068_v44 = vpop.eup %1067  ;;  %v779_v45 = vsub.f32 %v1362_v17, %v753_v42 }
 0x243   : > { %v1070_v46 = vpop.eup %1069  ;;  %802 = vst [vmem:[%s1391_s13 + $0x60] sm:$0xff] %v786_v43  ;;  %v755_v53 = vmul.f32 0.6931472, %v1068_v44 }
 0x244   : > { %795 = vst [vmem:[%s1391_s13 + $0x28] sm:$0xff] %v779_v45  ;;  %v769_v47 = vmul.f32 0.6931472, %v1070_v46 }
 0x245   : > { %v780_v52 = vsub.f32 %v1367_v23, %v755_v53 }
 0x246   : > { %v1072_v3 = vpop.eup %1071  ;;  %v787_v48 = vsub.f32 %v1370_v24, %v769_v47 }
 0x247   : > { %v1074_v49 = vpop.eup %1073  ;;  %796 = vst [vmem:[%s1391_s13 + $0x30] sm:$0xff] %v780_v52  ;;  %v771_v50 = vmul.f32 0.6931472, %v1072_v3 }
 0x248   : > { %803 = vst [vmem:[%s1391_s13 + $0x68] sm:$0xff] %v787_v48  ;;  %v757_v61 = vmul.f32 0.6931472, %v1074_v49 }
 0x249   : > { %v788_v17 = vsub.f32 %v1375_v32, %v771_v50 }
 0x24a   : > { %v1076_v51 = vpop.eup %1075  ;;  %v781_v12 = vsub.f32 %v1378_v33, %v757_v61 }
 0x24b   : > { %804 = vst [vmem:[%s1391_s13 + $0x70] sm:$0xff] %v788_v17  ;;  %v773_v56 = vmul.f32 0.6931472, %v1076_v51 }
 0x24c   : > { %797 = vst [vmem:[%s1391_s13 + $0x38] sm:$0xff] %v781_v12 }
 0x24d   : > { %v789_v57 = vsub.f32 %v1383_v63, %v773_v56 }
 0x24f   : > { %805 = vst [vmem:[%s1391_s13 + $0x78] sm:$0xff] %v789_v57 }
 0x250 PF: > { %s14_s15 = sadd.s32 1, %s1083_s15  }
 0x251   : > { %p11_p5 = scmp.ge.s32.totalorder %s14_s15, 4  }
 0x253   :  { %13 = sbr.rel (!%p11_p5) target bundleno = 1 (0x1), region = 69 }

</bundles_post_ra>
